<compile_context>
chip_gen: v6e
topology: v6e:2x2x1
jax: 0.10.0
libtpu: 0.0.40
codegen_flags: <defaults>
</compile_context>

<pallas_src>
import math

import jax
import jax.numpy as jnp
from jax.experimental import pallas as pl
from jax.experimental.pallas import tpu as pltpu

LANE = 128
SUBLANE = 8


def _round_up(v, m):
    return (v + m - 1) // m * m


def make_encoder_kernel(num_heads: int, d_k: int, dkp: int, tb: int,
                        seq_p: int, seq_valid: int):
    inv_sqrt_dk = 1.0 / math.sqrt(d_k)

    def kernel(x_ref, wq_ref, bq_ref, wk_ref, bk_ref, wv_ref, bv_ref,
               wo_ref, bo_ref, w1_ref, b1_ref, w2_ref, b2_ref, o_ref):
        rows, dp = x_ref.shape            # (tb*Sp, Dp) -- static block shape
        x = x_ref[...]                    # bf16

        # --- LSHSelfAttention: Q / K / V projections (one big MXU matmul each)
        q = jnp.dot(x, wq_ref[...], preferred_element_type=jnp.float32) + bq_ref[...]
        k = jnp.dot(x, wk_ref[...], preferred_element_type=jnp.float32) + bk_ref[...]
        v = jnp.dot(x, wv_ref[...], preferred_element_type=jnp.float32) + bv_ref[...]
        hd = q.shape[-1]                  # H * dkp (multiple of 128)

        q3 = q.reshape(tb, seq_p, hd).astype(jnp.bfloat16)
        k3 = k.reshape(tb, seq_p, hd).astype(jnp.bfloat16)
        v3 = v.reshape(tb, seq_p, hd).astype(jnp.bfloat16)

        # Mask for zero-padded key positions (trace-time static branch).
        pad_keys = seq_p != seq_valid
        if pad_keys:
            kmask = jax.lax.broadcasted_iota(jnp.int32, (1, 1, seq_p), 2) < seq_valid

        wo = wo_ref[...]                  # bf16 (H*dkp, Dp)
        ao = jnp.zeros((rows, dp), jnp.float32)

        # Head-batched attention: each head contracts over its own dkp lanes
        # (not the full padded d_model), so QK^T / PV do the exact MXU FLOPs.
        # The out-projection is folded in per head -> no concat, no lane scatter.
        for h in range(num_heads):        # static, unrolled
            lo = h * dkp
            q_h = q3[:, :, lo:lo + dkp]
            k_h = k3[:, :, lo:lo + dkp]
            v_h = v3[:, :, lo:lo + dkp]
            s = jnp.einsum('bqd,bkd->bqk', q_h, k_h,
                           preferred_element_type=jnp.float32) * inv_sqrt_dk
            if pad_keys:
                s = jnp.where(kmask, s, jnp.float32(-1e30))
            s = s - jnp.max(s, axis=-1, keepdims=True)
            p = jnp.exp(s)
            p = p * pl.reciprocal(jnp.sum(p, axis=-1, keepdims=True), approx=True)
            attn_h = jnp.einsum('bqk,bkd->bqd', p.astype(jnp.bfloat16), v_h,
                                preferred_element_type=jnp.float32)
            ao = ao + jnp.dot(attn_h.reshape(rows, dkp).astype(jnp.bfloat16),
                              wo[lo:lo + dkp, :],
                              preferred_element_type=jnp.float32)
        ao = ao + bo_ref[...]

        # --- feed_forward: Linear -> ReLU -> (Dropout = id) -> Linear --------
        h1 = jnp.dot(ao.astype(jnp.bfloat16), w1_ref[...],
                     preferred_element_type=jnp.float32) + b1_ref[...]
        h1 = jnp.maximum(h1, 0.0)
        out = jnp.dot(h1.astype(jnp.bfloat16), w2_ref[...],
                      preferred_element_type=jnp.float32) + b2_ref[...]

        o_ref[...] = out.astype(o_ref.dtype)

    return kernel


def lsh_encoder_layer(x, params, num_heads: int):
    """x: (B, S, D) float32.  params: f32 weights stored (in, out), biases (1, out)."""
    B, S, D = x.shape
    assert D % num_heads == 0
    d_k = D // num_heads
    F = params["w1"].shape[1]

    Dp = _round_up(D, LANE)
    Fp = _round_up(F, LANE)
    # Per-head padded width: multiple of 8 sublanes and H*dkp a multiple of 128
    # lanes -> head blocks are slice-friendly and the projection width stays
    # lane-dense with no "virtual" heads.
    mult = max(SUBLANE, LANE // math.gcd(num_heads, LANE))
    dkp = _round_up(d_k, mult)
    HD = num_heads * dkp

    # Physical VMEM (for rows-cap + scoped-vmem limit); conservative fallback.
    try:
        phys_vmem = int(pltpu.get_tpu_info().vmem_capacity_bytes)
    except Exception:
        phys_vmem = 64 << 20              # v7x per-core VMEM

    # --- tiling --------------------------------------------------------------
    Sp = _round_up(S, SUBLANE)
    rows_cap = 512 if phys_vmem <= (64 << 20) else 1024   # v7x vs v5e/v6e
    tb = 1
    for cand in range(B, 0, -1):
        if B % cand:
            continue
        if cand * Sp > rows_cap and cand > 1:
            continue
        if B > 1 and B // cand < 2:       # keep >=2 grid steps for v7x megacore
            continue
        tb = cand
        break
    if (tb * Sp) % 16:                    # bf16 x blocks want 16-row alignment
        Sp = _round_up(S, 16)
    rows_tile = tb * Sp
    n_steps = B // tb

    # --- pad / rearrange operands (exact: padded rows/cols/keys contribute 0) -
    def pad2(a, r, c):
        return jnp.pad(a, ((0, r - a.shape[0]), (0, c - a.shape[1])))

    def head_cols(w, b):   # (D, H*d_k), (1, H*d_k) -> (Dp, HD) bf16, (1, HD) f32
        w = w.reshape(D, num_heads, d_k)
        w = jnp.pad(w, ((0, Dp - D), (0, 0), (0, dkp - d_k))).reshape(Dp, HD)
        b = b.reshape(1, num_heads, d_k)
        b = jnp.pad(b, ((0, 0), (0, 0), (0, dkp - d_k))).reshape(1, HD)
        return w.astype(jnp.bfloat16), b

    def head_rows(w):      # (H*d_k, D) -> (HD, Dp) bf16
        w = w.reshape(num_heads, d_k, D)
        w = jnp.pad(w, ((0, 0), (0, dkp - d_k), (0, Dp - D))).reshape(HD, Dp)
        return w.astype(jnp.bfloat16)

    x_p = jnp.pad(x, ((0, 0), (0, Sp - S), (0, Dp - D)))
    x_p = x_p.reshape(B * Sp, Dp).astype(jnp.bfloat16)

    wq, bq = head_cols(params["wq"], params["bq"])
    wk, bk = head_cols(params["wk"], params["bk"])
    wv, bv = head_cols(params["wv"], params["bv"])
    wo = head_rows(params["wo"])
    bo = pad2(params["bo"], 1, Dp)
    w1 = pad2(params["w1"], Dp, Fp).astype(jnp.bfloat16)
    b1 = pad2(params["b1"], 1, Fp)
    w2 = pad2(params["w2"], Fp, Dp).astype(jnp.bfloat16)
    b2 = pad2(params["b2"], 1, Dp)

    # --- resident-set accounting / specs --------------------------------------
    weight_bytes = 2 * (3 * Dp * HD + HD * Dp + Dp * Fp + Fp * Dp)   # bf16
    bias_bytes = 4 * (3 * HD + 2 * Dp + Fp)                           # f32

    # Weights/biases have a constant index_map (resident blocks): double-
    # buffering buys nothing, so single-buffer them once they are big enough to
    # matter (halves weight VMEM; the v7x 64 MiB case).  Tiny weights keep the
    # default buffering.
    single_buffer_weights = weight_bytes > (8 << 20)

    def wspec(shape):
        if single_buffer_weights:
            return pl.BlockSpec(shape, lambda i: (0, 0),
                                pipeline_mode=pl.Buffered(buffer_count=1))
        return pl.BlockSpec(shape, lambda i: (0, 0))

    wbuf = 1 if single_buffer_weights else 2
    io_bytes = 2 * rows_tile * Dp * 2 + 2 * rows_tile * Dp * 4        # x + out, 2-buf
    inter_bytes = rows_tile * (3 * HD + 2 * Dp + Fp) * 4 + 2 * tb * Sp * Sp * 4
    vmem_need = (wbuf * weight_bytes + 2 * bias_bytes + io_bytes + inter_bytes
                 + (8 << 20))                                         # margin
    vmem_limit = int(min(max(vmem_need, 32 << 20), int(phys_vmem * 0.8)))

    # --- cost estimate (weights counted ONCE; attention contracts over dkp) ---
    rows_total = B * Sp
    flops = (2 * rows_total * Dp * HD * 3          # Q, K, V projections
             + 2 * rows_total * HD * Dp            # out projection
             + 2 * rows_total * Dp * Fp            # FFN up
             + 2 * rows_total * Fp * Dp            # FFN down
             + 4 * B * num_heads * Sp * Sp * dkp)  # QK^T + PV
    transcendentals = B * num_heads * Sp * Sp
    bytes_accessed = (rows_total * Dp * 2          # x read (bf16)
                      + rows_total * Dp * 4        # out write (f32)
                      + weight_bytes + bias_bytes) # weights fetched once
    cost = pl.CostEstimate(flops=int(flops),
                           transcendentals=int(transcendentals),
                           bytes_accessed=int(bytes_accessed))

    kernel = make_encoder_kernel(num_heads, d_k, dkp, tb, Sp, S)

    grid_spec = pltpu.PrefetchScalarGridSpec(
        num_scalar_prefetch=0,
        grid=(n_steps,),
        in_specs=[
            pl.BlockSpec((rows_tile, Dp), lambda i: (i, 0)),   # x rows
            wspec((Dp, HD)), wspec((1, HD)),                   # wq, bq
            wspec((Dp, HD)), wspec((1, HD)),                   # wk, bk
            wspec((Dp, HD)), wspec((1, HD)),                   # wv, bv
            wspec((HD, Dp)), wspec((1, Dp)),                   # wo, bo
            wspec((Dp, Fp)), wspec((1, Fp)),                   # w1, b1
            wspec((Fp, Dp)), wspec((1, Dp)),                   # w2, b2
        ],
        out_specs=pl.BlockSpec((rows_tile, Dp), lambda i: (i, 0)),
    )

    out = pl.pallas_call(
        kernel,
        out_shape=jax.ShapeDtypeStruct((B * Sp, Dp), jnp.float32),
        grid_spec=grid_spec,
        compiler_params=pltpu.CompilerParams(
            dimension_semantics=("parallel",),
            vmem_limit_bytes=vmem_limit),
        cost_estimate=cost,
    )(x_p, wq, bq, wk, bk, wv, bv, wo, bo, w1, b1, w2, b2)

    return out.reshape(B, Sp, Dp)[:, :S, :D]


def init_params(key, d_model: int, d_forward: int):
    """Deterministic PyTorch-Linear-style init; weights stored (in, out), f32."""
    def linear(k, fan_in, fan_out):
        kw, kb = jax.random.split(k)
        bound = 1.0 / math.sqrt(fan_in)
        w = jax.random.uniform(kw, (fan_in, fan_out), jnp.float32, -bound, bound)
        b = jax.random.uniform(kb, (1, fan_out), jnp.float32, -bound, bound)
        return w, b

    keys = jax.random.split(key, 6)
    wq, bq = linear(keys[0], d_model, d_model)
    wk, bk = linear(keys[1], d_model, d_model)
    wv, bv = linear(keys[2], d_model, d_model)
    wo, bo = linear(keys[3], d_model, d_model)
    w1, b1 = linear(keys[4], d_model, d_forward)
    w2, b2 = linear(keys[5], d_forward, d_model)
    return dict(wq=wq, bq=bq, wk=wk, bk=bk, wv=wv, bv=bv, wo=wo, bo=bo,
                w1=w1, b1=b1, w2=w2, b2=b2)


if __name__ == "__main__":
    # Small shapes consistent with the module: batch=2, seq=8, d_model=32,
    # num_heads=4, d_forward=64.  (bucket_size / num_hashes are unused by the
    # reference forward and omitted.)
    B, S, D, H, F = 2, 8, 32, 4, 64

    key = jax.random.PRNGKey(0)
    kx, kp = jax.random.split(key)
    x = jax.random.normal(kx, (B, S, D), jnp.float32)
    params = init_params(kp, D, F)

    out = lsh_encoder_layer(x, params, num_heads=H)
    out = jax.block_until_ready(out)

    assert out.shape == (B, S, D) and out.dtype == jnp.float32
    assert bool(jnp.all(jnp.isfinite(out)))
    print("KERNEL_OK")
</pallas_src>

<mosaic_0001>
module attributes {stable_mosaic.version = 11 : i64} {
  func.func @kernel(%arg0: i32, %arg1: memref<16x128xbf16, #tpu.memory_space<vmem>>, %arg2: memref<128x128xbf16, #tpu.memory_space<vmem>>, %arg3: memref<1x128xf32, #tpu.memory_space<vmem>>, %arg4: memref<128x128xbf16, #tpu.memory_space<vmem>>, %arg5: memref<1x128xf32, #tpu.memory_space<vmem>>, %arg6: memref<128x128xbf16, #tpu.memory_space<vmem>>, %arg7: memref<1x128xf32, #tpu.memory_space<vmem>>, %arg8: memref<128x128xbf16, #tpu.memory_space<vmem>>, %arg9: memref<1x128xf32, #tpu.memory_space<vmem>>, %arg10: memref<128x128xbf16, #tpu.memory_space<vmem>>, %arg11: memref<1x128xf32, #tpu.memory_space<vmem>>, %arg12: memref<128x128xbf16, #tpu.memory_space<vmem>>, %arg13: memref<1x128xf32, #tpu.memory_space<vmem>>, %arg14: memref<16x128xf32, #tpu.memory_space<vmem>>) attributes {dimension_semantics = [#tpu.dimension_semantics<parallel>], iteration_bounds = array<i64: 2>, scalar_prefetch = 0 : i64, scratch_operands = 0 : i64, tpu.core_type = #tpu.core_type<tc>, window_params = [{transform_indices = @transform_0, window_bounds = array<i64: 16, 128>}, {pipeline_mode = #tpu.pipeline_mode<synchronous>, transform_indices = @transform_1, window_bounds = array<i64: 128, 128>}, {pipeline_mode = #tpu.pipeline_mode<synchronous>, transform_indices = @transform_2, window_bounds = array<i64: 1, 128>}, {pipeline_mode = #tpu.pipeline_mode<synchronous>, transform_indices = @transform_3, window_bounds = array<i64: 128, 128>}, {pipeline_mode = #tpu.pipeline_mode<synchronous>, transform_indices = @transform_4, window_bounds = array<i64: 1, 128>}, {pipeline_mode = #tpu.pipeline_mode<synchronous>, transform_indices = @transform_5, window_bounds = array<i64: 128, 128>}, {pipeline_mode = #tpu.pipeline_mode<synchronous>, transform_indices = @transform_6, window_bounds = array<i64: 1, 128>}, {pipeline_mode = #tpu.pipeline_mode<synchronous>, transform_indices = @transform_7, window_bounds = array<i64: 128, 128>}, {pipeline_mode = #tpu.pipeline_mode<synchronous>, transform_indices = @transform_8, window_bounds = array<i64: 1, 128>}, {pipeline_mode = #tpu.pipeline_mode<synchronous>, transform_indices = @transform_9, window_bounds = array<i64: 128, 128>}, {pipeline_mode = #tpu.pipeline_mode<synchronous>, transform_indices = @transform_10, window_bounds = array<i64: 1, 128>}, {pipeline_mode = #tpu.pipeline_mode<synchronous>, transform_indices = @transform_11, window_bounds = array<i64: 128, 128>}, {pipeline_mode = #tpu.pipeline_mode<synchronous>, transform_indices = @transform_12, window_bounds = array<i64: 1, 128>}, {transform_indices = @transform_13, window_bounds = array<i64: 16, 128>}]} {
    %c0 = arith.constant 0 : index
    %c0_0 = arith.constant 0 : index
    %0 = vector.load %arg1[%c0, %c0_0] : memref<16x128xbf16, #tpu.memory_space<vmem>>, vector<16x128xbf16>
    %c0_1 = arith.constant 0 : index
    %c0_2 = arith.constant 0 : index
    %1 = vector.load %arg2[%c0_1, %c0_2] : memref<128x128xbf16, #tpu.memory_space<vmem>>, vector<128x128xbf16>
    %cst = arith.constant dense<0.000000e+00> : vector<16x128xf32>
    %2 = tpu.matmul %0, %1, %cst {dimension_numbers = #tpu.dot_dimension_numbers<[1], [0], [0], [1], [0, 0, 1, 1], [], []>} : vector<16x128xbf16>, vector<128x128xbf16>, vector<16x128xf32> -> vector<16x128xf32>
    %c0_3 = arith.constant 0 : index
    %c0_4 = arith.constant 0 : index
    %3 = vector.load %arg3[%c0_3, %c0_4] : memref<1x128xf32, #tpu.memory_space<vmem>>, vector<1x128xf32>
    %4 = vector.broadcast %3 : vector<1x128xf32> to vector<16x128xf32>
    %5 = arith.addf %2, %4 : vector<16x128xf32>
    %c0_5 = arith.constant 0 : index
    %c0_6 = arith.constant 0 : index
    %6 = vector.load %arg4[%c0_5, %c0_6] : memref<128x128xbf16, #tpu.memory_space<vmem>>, vector<128x128xbf16>
    %cst_7 = arith.constant dense<0.000000e+00> : vector<16x128xf32>
    %7 = tpu.matmul %0, %6, %cst_7 {dimension_numbers = #tpu.dot_dimension_numbers<[1], [0], [0], [1], [0, 0, 1, 1], [], []>} : vector<16x128xbf16>, vector<128x128xbf16>, vector<16x128xf32> -> vector<16x128xf32>
    %c0_8 = arith.constant 0 : index
    %c0_9 = arith.constant 0 : index
    %8 = vector.load %arg5[%c0_8, %c0_9] : memref<1x128xf32, #tpu.memory_space<vmem>>, vector<1x128xf32>
    %9 = vector.broadcast %8 : vector<1x128xf32> to vector<16x128xf32>
    %10 = arith.addf %7, %9 : vector<16x128xf32>
    %c0_10 = arith.constant 0 : index
    %c0_11 = arith.constant 0 : index
    %11 = vector.load %arg6[%c0_10, %c0_11] : memref<128x128xbf16, #tpu.memory_space<vmem>>, vector<128x128xbf16>
    %cst_12 = arith.constant dense<0.000000e+00> : vector<16x128xf32>
    %12 = tpu.matmul %0, %11, %cst_12 {dimension_numbers = #tpu.dot_dimension_numbers<[1], [0], [0], [1], [0, 0, 1, 1], [], []>} : vector<16x128xbf16>, vector<128x128xbf16>, vector<16x128xf32> -> vector<16x128xf32>
    %c0_13 = arith.constant 0 : index
    %c0_14 = arith.constant 0 : index
    %13 = vector.load %arg7[%c0_13, %c0_14] : memref<1x128xf32, #tpu.memory_space<vmem>>, vector<1x128xf32>
    %14 = vector.broadcast %13 : vector<1x128xf32> to vector<16x128xf32>
    %15 = arith.addf %12, %14 : vector<16x128xf32>
    %16 = vector.shape_cast %5 : vector<16x128xf32> to vector<1x16x128xf32>
    %17 = arith.truncf %16 : vector<1x16x128xf32> to vector<1x16x128xbf16>
    %18 = vector.shape_cast %10 : vector<16x128xf32> to vector<1x16x128xf32>
    %19 = arith.truncf %18 : vector<1x16x128xf32> to vector<1x16x128xbf16>
    %20 = vector.shape_cast %15 : vector<16x128xf32> to vector<1x16x128xf32>
    %21 = arith.truncf %20 : vector<1x16x128xf32> to vector<1x16x128xbf16>
    %22 = tpu.iota {dimensions = array<i32: 2>} : vector<1x1x16xi32>
    %c8_i32 = arith.constant 8 : i32
    %23 = vector.broadcast %c8_i32 : i32 to vector<1x1x16xi32>
    %24 = arith.cmpi slt, %22, %23 : vector<1x1x16xi32>
    %c0_15 = arith.constant 0 : index
    %c0_16 = arith.constant 0 : index
    %25 = vector.load %arg8[%c0_15, %c0_16] : memref<128x128xbf16, #tpu.memory_space<vmem>>, vector<128x128xbf16>
    %cst_17 = arith.constant 0.000000e+00 : f32
    %26 = vector.broadcast %cst_17 : f32 to vector<16x128xf32>
    %27 = vector.extract_strided_slice %17 {offsets = [0, 0, 0], sizes = [1, 16, 32], strides = [1, 1, 1]} : vector<1x16x128xbf16> to vector<1x16x32xbf16>
    %28 = vector.extract_strided_slice %19 {offsets = [0, 0, 0], sizes = [1, 16, 32], strides = [1, 1, 1]} : vector<1x16x128xbf16> to vector<1x16x32xbf16>
    %29 = vector.extract_strided_slice %21 {offsets = [0, 0, 0], sizes = [1, 16, 32], strides = [1, 1, 1]} : vector<1x16x128xbf16> to vector<1x16x32xbf16>
    "tpu.trace_start"() <{level = 10 : i32, message = "bqd,bkd->bqk"}> : () -> ()
    %cst_18 = arith.constant dense<0.000000e+00> : vector<1x16x16xf32>
    %30 = tpu.matmul %27, %28, %cst_18 {dimension_numbers = #tpu.dot_dimension_numbers<[2], [2], [1], [1], [0, 0, 0, 1, 1, 1], [0], [0]>} : vector<1x16x32xbf16>, vector<1x16x32xbf16>, vector<1x16x16xf32> -> vector<1x16x16xf32>
    "tpu.trace_stop"() : () -> ()
    %cst_19 = arith.constant 0.353553385 : f32
    %31 = vector.broadcast %cst_19 : f32 to vector<1x16x16xf32>
    %32 = arith.mulf %30, %31 : vector<1x16x16xf32>
    %cst_20 = arith.constant -1.000000e+30 : f32
    %33 = vector.shape_cast %24 : vector<1x1x16xi1> to vector<1x1x16xi1>
    %34 = vector.broadcast %33 : vector<1x1x16xi1> to vector<1x16x16xi1>
    %35 = vector.broadcast %cst_20 : f32 to vector<1x16x16xf32>
    %36 = arith.select %34, %32, %35 : vector<1x16x16xi1>, vector<1x16x16xf32>
    %cst_21 = arith.constant dense<0xFF800000> : vector<1x16xf32>
    %37 = vector.multi_reduction <maximumf>, %36, %cst_21 [2] : vector<1x16x16xf32> to vector<1x16xf32>
    %38 = vector.shape_cast %37 : vector<1x16xf32> to vector<1x16x1xf32>
    %39 = vector.broadcast %38 : vector<1x16x1xf32> to vector<1x16x16xf32>
    %40 = arith.subf %36, %39 : vector<1x16x16xf32>
    %41 = math.exp %40 : vector<1x16x16xf32>
    %cst_22 = arith.constant dense<0.000000e+00> : vector<1x16xf32>
    %42 = vector.multi_reduction <add>, %41, %cst_22 [2] : vector<1x16x16xf32> to vector<1x16xf32>
    %43 = vector.shape_cast %42 : vector<1x16xf32> to vector<1x16x1xf32>
    %44 = tpu.reciprocal %43 {approx = true} : vector<1x16x1xf32> -> vector<1x16x1xf32>
    %45 = vector.broadcast %44 : vector<1x16x1xf32> to vector<1x16x16xf32>
    %46 = arith.mulf %41, %45 : vector<1x16x16xf32>
    %47 = arith.truncf %46 : vector<1x16x16xf32> to vector<1x16x16xbf16>
    "tpu.trace_start"() <{level = 10 : i32, message = "bqk,bkd->bqd"}> : () -> ()
    %cst_23 = arith.constant dense<0.000000e+00> : vector<1x16x32xf32>
    %48 = tpu.matmul %47, %29, %cst_23 {dimension_numbers = #tpu.dot_dimension_numbers<[2], [1], [1], [2], [0, 0, 0, 1, 1, 2], [0], [0]>} : vector<1x16x16xbf16>, vector<1x16x32xbf16>, vector<1x16x32xf32> -> vector<1x16x32xf32>
    "tpu.trace_stop"() : () -> ()
    %49 = vector.shape_cast %48 : vector<1x16x32xf32> to vector<16x32xf32>
    %50 = arith.truncf %49 : vector<16x32xf32> to vector<16x32xbf16>
    %51 = vector.extract_strided_slice %25 {offsets = [0, 0], sizes = [32, 128], strides = [1, 1]} : vector<128x128xbf16> to vector<32x128xbf16>
    %cst_24 = arith.constant dense<0.000000e+00> : vector<16x128xf32>
    %52 = tpu.matmul %50, %51, %cst_24 {dimension_numbers = #tpu.dot_dimension_numbers<[1], [0], [0], [1], [0, 0, 1, 1], [], []>} : vector<16x32xbf16>, vector<32x128xbf16>, vector<16x128xf32> -> vector<16x128xf32>
    %53 = arith.addf %26, %52 : vector<16x128xf32>
    %54 = vector.extract_strided_slice %17 {offsets = [0, 0, 32], sizes = [1, 16, 32], strides = [1, 1, 1]} : vector<1x16x128xbf16> to vector<1x16x32xbf16>
    %55 = vector.extract_strided_slice %19 {offsets = [0, 0, 32], sizes = [1, 16, 32], strides = [1, 1, 1]} : vector<1x16x128xbf16> to vector<1x16x32xbf16>
    %56 = vector.extract_strided_slice %21 {offsets = [0, 0, 32], sizes = [1, 16, 32], strides = [1, 1, 1]} : vector<1x16x128xbf16> to vector<1x16x32xbf16>
    "tpu.trace_start"() <{level = 10 : i32, message = "bqd,bkd->bqk"}> : () -> ()
    %cst_25 = arith.constant dense<0.000000e+00> : vector<1x16x16xf32>
    %57 = tpu.matmul %54, %55, %cst_25 {dimension_numbers = #tpu.dot_dimension_numbers<[2], [2], [1], [1], [0, 0, 0, 1, 1, 1], [0], [0]>} : vector<1x16x32xbf16>, vector<1x16x32xbf16>, vector<1x16x16xf32> -> vector<1x16x16xf32>
    "tpu.trace_stop"() : () -> ()
    %cst_26 = arith.constant 0.353553385 : f32
    %58 = vector.broadcast %cst_26 : f32 to vector<1x16x16xf32>
    %59 = arith.mulf %57, %58 : vector<1x16x16xf32>
    %cst_27 = arith.constant -1.000000e+30 : f32
    %60 = vector.shape_cast %24 : vector<1x1x16xi1> to vector<1x1x16xi1>
    %61 = vector.broadcast %60 : vector<1x1x16xi1> to vector<1x16x16xi1>
    %62 = vector.broadcast %cst_27 : f32 to vector<1x16x16xf32>
    %63 = arith.select %61, %59, %62 : vector<1x16x16xi1>, vector<1x16x16xf32>
    %cst_28 = arith.constant dense<0xFF800000> : vector<1x16xf32>
    %64 = vector.multi_reduction <maximumf>, %63, %cst_28 [2] : vector<1x16x16xf32> to vector<1x16xf32>
    %65 = vector.shape_cast %64 : vector<1x16xf32> to vector<1x16x1xf32>
    %66 = vector.broadcast %65 : vector<1x16x1xf32> to vector<1x16x16xf32>
    %67 = arith.subf %63, %66 : vector<1x16x16xf32>
    %68 = math.exp %67 : vector<1x16x16xf32>
    %cst_29 = arith.constant dense<0.000000e+00> : vector<1x16xf32>
    %69 = vector.multi_reduction <add>, %68, %cst_29 [2] : vector<1x16x16xf32> to vector<1x16xf32>
    %70 = vector.shape_cast %69 : vector<1x16xf32> to vector<1x16x1xf32>
    %71 = tpu.reciprocal %70 {approx = true} : vector<1x16x1xf32> -> vector<1x16x1xf32>
    %72 = vector.broadcast %71 : vector<1x16x1xf32> to vector<1x16x16xf32>
    %73 = arith.mulf %68, %72 : vector<1x16x16xf32>
    %74 = arith.truncf %73 : vector<1x16x16xf32> to vector<1x16x16xbf16>
    "tpu.trace_start"() <{level = 10 : i32, message = "bqk,bkd->bqd"}> : () -> ()
    %cst_30 = arith.constant dense<0.000000e+00> : vector<1x16x32xf32>
    %75 = tpu.matmul %74, %56, %cst_30 {dimension_numbers = #tpu.dot_dimension_numbers<[2], [1], [1], [2], [0, 0, 0, 1, 1, 2], [0], [0]>} : vector<1x16x16xbf16>, vector<1x16x32xbf16>, vector<1x16x32xf32> -> vector<1x16x32xf32>
    "tpu.trace_stop"() : () -> ()
    %76 = vector.shape_cast %75 : vector<1x16x32xf32> to vector<16x32xf32>
    %77 = arith.truncf %76 : vector<16x32xf32> to vector<16x32xbf16>
    %78 = vector.extract_strided_slice %25 {offsets = [32, 0], sizes = [32, 128], strides = [1, 1]} : vector<128x128xbf16> to vector<32x128xbf16>
    %cst_31 = arith.constant dense<0.000000e+00> : vector<16x128xf32>
    %79 = tpu.matmul %77, %78, %cst_31 {dimension_numbers = #tpu.dot_dimension_numbers<[1], [0], [0], [1], [0, 0, 1, 1], [], []>} : vector<16x32xbf16>, vector<32x128xbf16>, vector<16x128xf32> -> vector<16x128xf32>
    %80 = arith.addf %53, %79 : vector<16x128xf32>
    %81 = vector.extract_strided_slice %17 {offsets = [0, 0, 64], sizes = [1, 16, 32], strides = [1, 1, 1]} : vector<1x16x128xbf16> to vector<1x16x32xbf16>
    %82 = vector.extract_strided_slice %19 {offsets = [0, 0, 64], sizes = [1, 16, 32], strides = [1, 1, 1]} : vector<1x16x128xbf16> to vector<1x16x32xbf16>
    %83 = vector.extract_strided_slice %21 {offsets = [0, 0, 64], sizes = [1, 16, 32], strides = [1, 1, 1]} : vector<1x16x128xbf16> to vector<1x16x32xbf16>
    "tpu.trace_start"() <{level = 10 : i32, message = "bqd,bkd->bqk"}> : () -> ()
    %cst_32 = arith.constant dense<0.000000e+00> : vector<1x16x16xf32>
    %84 = tpu.matmul %81, %82, %cst_32 {dimension_numbers = #tpu.dot_dimension_numbers<[2], [2], [1], [1], [0, 0, 0, 1, 1, 1], [0], [0]>} : vector<1x16x32xbf16>, vector<1x16x32xbf16>, vector<1x16x16xf32> -> vector<1x16x16xf32>
    "tpu.trace_stop"() : () -> ()
    %cst_33 = arith.constant 0.353553385 : f32
    %85 = vector.broadcast %cst_33 : f32 to vector<1x16x16xf32>
    %86 = arith.mulf %84, %85 : vector<1x16x16xf32>
    %cst_34 = arith.constant -1.000000e+30 : f32
    %87 = vector.shape_cast %24 : vector<1x1x16xi1> to vector<1x1x16xi1>
    %88 = vector.broadcast %87 : vector<1x1x16xi1> to vector<1x16x16xi1>
    %89 = vector.broadcast %cst_34 : f32 to vector<1x16x16xf32>
    %90 = arith.select %88, %86, %89 : vector<1x16x16xi1>, vector<1x16x16xf32>
    %cst_35 = arith.constant dense<0xFF800000> : vector<1x16xf32>
    %91 = vector.multi_reduction <maximumf>, %90, %cst_35 [2] : vector<1x16x16xf32> to vector<1x16xf32>
    %92 = vector.shape_cast %91 : vector<1x16xf32> to vector<1x16x1xf32>
    %93 = vector.broadcast %92 : vector<1x16x1xf32> to vector<1x16x16xf32>
    %94 = arith.subf %90, %93 : vector<1x16x16xf32>
    %95 = math.exp %94 : vector<1x16x16xf32>
    %cst_36 = arith.constant dense<0.000000e+00> : vector<1x16xf32>
    %96 = vector.multi_reduction <add>, %95, %cst_36 [2] : vector<1x16x16xf32> to vector<1x16xf32>
    %97 = vector.shape_cast %96 : vector<1x16xf32> to vector<1x16x1xf32>
    %98 = tpu.reciprocal %97 {approx = true} : vector<1x16x1xf32> -> vector<1x16x1xf32>
    %99 = vector.broadcast %98 : vector<1x16x1xf32> to vector<1x16x16xf32>
    %100 = arith.mulf %95, %99 : vector<1x16x16xf32>
    %101 = arith.truncf %100 : vector<1x16x16xf32> to vector<1x16x16xbf16>
    "tpu.trace_start"() <{level = 10 : i32, message = "bqk,bkd->bqd"}> : () -> ()
    %cst_37 = arith.constant dense<0.000000e+00> : vector<1x16x32xf32>
    %102 = tpu.matmul %101, %83, %cst_37 {dimension_numbers = #tpu.dot_dimension_numbers<[2], [1], [1], [2], [0, 0, 0, 1, 1, 2], [0], [0]>} : vector<1x16x16xbf16>, vector<1x16x32xbf16>, vector<1x16x32xf32> -> vector<1x16x32xf32>
    "tpu.trace_stop"() : () -> ()
    %103 = vector.shape_cast %102 : vector<1x16x32xf32> to vector<16x32xf32>
    %104 = arith.truncf %103 : vector<16x32xf32> to vector<16x32xbf16>
    %105 = vector.extract_strided_slice %25 {offsets = [64, 0], sizes = [32, 128], strides = [1, 1]} : vector<128x128xbf16> to vector<32x128xbf16>
    %cst_38 = arith.constant dense<0.000000e+00> : vector<16x128xf32>
    %106 = tpu.matmul %104, %105, %cst_38 {dimension_numbers = #tpu.dot_dimension_numbers<[1], [0], [0], [1], [0, 0, 1, 1], [], []>} : vector<16x32xbf16>, vector<32x128xbf16>, vector<16x128xf32> -> vector<16x128xf32>
    %107 = arith.addf %80, %106 : vector<16x128xf32>
    %108 = vector.extract_strided_slice %17 {offsets = [0, 0, 96], sizes = [1, 16, 32], strides = [1, 1, 1]} : vector<1x16x128xbf16> to vector<1x16x32xbf16>
    %109 = vector.extract_strided_slice %19 {offsets = [0, 0, 96], sizes = [1, 16, 32], strides = [1, 1, 1]} : vector<1x16x128xbf16> to vector<1x16x32xbf16>
    %110 = vector.extract_strided_slice %21 {offsets = [0, 0, 96], sizes = [1, 16, 32], strides = [1, 1, 1]} : vector<1x16x128xbf16> to vector<1x16x32xbf16>
    "tpu.trace_start"() <{level = 10 : i32, message = "bqd,bkd->bqk"}> : () -> ()
    %cst_39 = arith.constant dense<0.000000e+00> : vector<1x16x16xf32>
    %111 = tpu.matmul %108, %109, %cst_39 {dimension_numbers = #tpu.dot_dimension_numbers<[2], [2], [1], [1], [0, 0, 0, 1, 1, 1], [0], [0]>} : vector<1x16x32xbf16>, vector<1x16x32xbf16>, vector<1x16x16xf32> -> vector<1x16x16xf32>
    "tpu.trace_stop"() : () -> ()
    %cst_40 = arith.constant 0.353553385 : f32
    %112 = vector.broadcast %cst_40 : f32 to vector<1x16x16xf32>
    %113 = arith.mulf %111, %112 : vector<1x16x16xf32>
    %cst_41 = arith.constant -1.000000e+30 : f32
    %114 = vector.shape_cast %24 : vector<1x1x16xi1> to vector<1x1x16xi1>
    %115 = vector.broadcast %114 : vector<1x1x16xi1> to vector<1x16x16xi1>
    %116 = vector.broadcast %cst_41 : f32 to vector<1x16x16xf32>
    %117 = arith.select %115, %113, %116 : vector<1x16x16xi1>, vector<1x16x16xf32>
    %cst_42 = arith.constant dense<0xFF800000> : vector<1x16xf32>
    %118 = vector.multi_reduction <maximumf>, %117, %cst_42 [2] : vector<1x16x16xf32> to vector<1x16xf32>
    %119 = vector.shape_cast %118 : vector<1x16xf32> to vector<1x16x1xf32>
    %120 = vector.broadcast %119 : vector<1x16x1xf32> to vector<1x16x16xf32>
    %121 = arith.subf %117, %120 : vector<1x16x16xf32>
    %122 = math.exp %121 : vector<1x16x16xf32>
    %cst_43 = arith.constant dense<0.000000e+00> : vector<1x16xf32>
    %123 = vector.multi_reduction <add>, %122, %cst_43 [2] : vector<1x16x16xf32> to vector<1x16xf32>
    %124 = vector.shape_cast %123 : vector<1x16xf32> to vector<1x16x1xf32>
    %125 = tpu.reciprocal %124 {approx = true} : vector<1x16x1xf32> -> vector<1x16x1xf32>
    %126 = vector.broadcast %125 : vector<1x16x1xf32> to vector<1x16x16xf32>
    %127 = arith.mulf %122, %126 : vector<1x16x16xf32>
    %128 = arith.truncf %127 : vector<1x16x16xf32> to vector<1x16x16xbf16>
    "tpu.trace_start"() <{level = 10 : i32, message = "bqk,bkd->bqd"}> : () -> ()
    %cst_44 = arith.constant dense<0.000000e+00> : vector<1x16x32xf32>
    %129 = tpu.matmul %128, %110, %cst_44 {dimension_numbers = #tpu.dot_dimension_numbers<[2], [1], [1], [2], [0, 0, 0, 1, 1, 2], [0], [0]>} : vector<1x16x16xbf16>, vector<1x16x32xbf16>, vector<1x16x32xf32> -> vector<1x16x32xf32>
    "tpu.trace_stop"() : () -> ()
    %130 = vector.shape_cast %129 : vector<1x16x32xf32> to vector<16x32xf32>
    %131 = arith.truncf %130 : vector<16x32xf32> to vector<16x32xbf16>
    %132 = vector.extract_strided_slice %25 {offsets = [96, 0], sizes = [32, 128], strides = [1, 1]} : vector<128x128xbf16> to vector<32x128xbf16>
    %cst_45 = arith.constant dense<0.000000e+00> : vector<16x128xf32>
    %133 = tpu.matmul %131, %132, %cst_45 {dimension_numbers = #tpu.dot_dimension_numbers<[1], [0], [0], [1], [0, 0, 1, 1], [], []>} : vector<16x32xbf16>, vector<32x128xbf16>, vector<16x128xf32> -> vector<16x128xf32>
    %134 = arith.addf %107, %133 : vector<16x128xf32>
    %c0_46 = arith.constant 0 : index
    %c0_47 = arith.constant 0 : index
    %135 = vector.load %arg9[%c0_46, %c0_47] : memref<1x128xf32, #tpu.memory_space<vmem>>, vector<1x128xf32>
    %136 = vector.broadcast %135 : vector<1x128xf32> to vector<16x128xf32>
    %137 = arith.addf %134, %136 : vector<16x128xf32>
    %138 = arith.truncf %137 : vector<16x128xf32> to vector<16x128xbf16>
    %c0_48 = arith.constant 0 : index
    %c0_49 = arith.constant 0 : index
    %139 = vector.load %arg10[%c0_48, %c0_49] : memref<128x128xbf16, #tpu.memory_space<vmem>>, vector<128x128xbf16>
    %cst_50 = arith.constant dense<0.000000e+00> : vector<16x128xf32>
    %140 = tpu.matmul %138, %139, %cst_50 {dimension_numbers = #tpu.dot_dimension_numbers<[1], [0], [0], [1], [0, 0, 1, 1], [], []>} : vector<16x128xbf16>, vector<128x128xbf16>, vector<16x128xf32> -> vector<16x128xf32>
    %c0_51 = arith.constant 0 : index
    %c0_52 = arith.constant 0 : index
    %141 = vector.load %arg11[%c0_51, %c0_52] : memref<1x128xf32, #tpu.memory_space<vmem>>, vector<1x128xf32>
    %142 = vector.broadcast %141 : vector<1x128xf32> to vector<16x128xf32>
    %143 = arith.addf %140, %142 : vector<16x128xf32>
    %cst_53 = arith.constant 0.000000e+00 : f32
    %144 = vector.broadcast %cst_53 : f32 to vector<16x128xf32>
    %145 = arith.maximumf %143, %144 : vector<16x128xf32>
    %146 = arith.truncf %145 : vector<16x128xf32> to vector<16x128xbf16>
    %c0_54 = arith.constant 0 : index
    %c0_55 = arith.constant 0 : index
    %147 = vector.load %arg12[%c0_54, %c0_55] : memref<128x128xbf16, #tpu.memory_space<vmem>>, vector<128x128xbf16>
    %cst_56 = arith.constant dense<0.000000e+00> : vector<16x128xf32>
    %148 = tpu.matmul %146, %147, %cst_56 {dimension_numbers = #tpu.dot_dimension_numbers<[1], [0], [0], [1], [0, 0, 1, 1], [], []>} : vector<16x128xbf16>, vector<128x128xbf16>, vector<16x128xf32> -> vector<16x128xf32>
    %c0_57 = arith.constant 0 : index
    %c0_58 = arith.constant 0 : index
    %149 = vector.load %arg13[%c0_57, %c0_58] : memref<1x128xf32, #tpu.memory_space<vmem>>, vector<1x128xf32>
    %150 = vector.broadcast %149 : vector<1x128xf32> to vector<16x128xf32>
    %151 = arith.addf %148, %150 : vector<16x128xf32>
    %c0_59 = arith.constant 0 : index
    %c0_60 = arith.constant 0 : index
    %152 = vector.load %arg14[%c0_59, %c0_60] : memref<16x128xf32, #tpu.memory_space<vmem>>, vector<16x128xf32>
    tpu.vector_store %arg14[%c0_59, %c0_60], %151 {strides = array<i32>} : memref<16x128xf32, #tpu.memory_space<vmem>>, vector<16x128xf32>,
    return
  }
  func.func @transform_0(%arg0: i32) -> (i32, i32) {
    %c0_i32 = arith.constant 0 : i32
    %c0_i32_0 = arith.constant 0 : i32
    return %arg0, %c0_i32 : i32, i32
  }
  func.func @transform_1(%arg0: i32) -> (i32, i32) {
    %c0_i32 = arith.constant 0 : i32
    %c0_i32_0 = arith.constant 0 : i32
    %c0_i32_1 = arith.constant 0 : i32
    return %c0_i32, %c0_i32_0 : i32, i32
  }
  func.func @transform_2(%arg0: i32) -> (i32, i32) {
    %c0_i32 = arith.constant 0 : i32
    %c0_i32_0 = arith.constant 0 : i32
    %c0_i32_1 = arith.constant 0 : i32
    return %c0_i32, %c0_i32_0 : i32, i32
  }
  func.func @transform_3(%arg0: i32) -> (i32, i32) {
    %c0_i32 = arith.constant 0 : i32
    %c0_i32_0 = arith.constant 0 : i32
    %c0_i32_1 = arith.constant 0 : i32
    return %c0_i32, %c0_i32_0 : i32, i32
  }
  func.func @transform_4(%arg0: i32) -> (i32, i32) {
    %c0_i32 = arith.constant 0 : i32
    %c0_i32_0 = arith.constant 0 : i32
    %c0_i32_1 = arith.constant 0 : i32
    return %c0_i32, %c0_i32_0 : i32, i32
  }
  func.func @transform_5(%arg0: i32) -> (i32, i32) {
    %c0_i32 = arith.constant 0 : i32
    %c0_i32_0 = arith.constant 0 : i32
    %c0_i32_1 = arith.constant 0 : i32
    return %c0_i32, %c0_i32_0 : i32, i32
  }
  func.func @transform_6(%arg0: i32) -> (i32, i32) {
    %c0_i32 = arith.constant 0 : i32
    %c0_i32_0 = arith.constant 0 : i32
    %c0_i32_1 = arith.constant 0 : i32
    return %c0_i32, %c0_i32_0 : i32, i32
  }
  func.func @transform_7(%arg0: i32) -> (i32, i32) {
    %c0_i32 = arith.constant 0 : i32
    %c0_i32_0 = arith.constant 0 : i32
    %c0_i32_1 = arith.constant 0 : i32
    return %c0_i32, %c0_i32_0 : i32, i32
  }
  func.func @transform_8(%arg0: i32) -> (i32, i32) {
    %c0_i32 = arith.constant 0 : i32
    %c0_i32_0 = arith.constant 0 : i32
    %c0_i32_1 = arith.constant 0 : i32
    return %c0_i32, %c0_i32_0 : i32, i32
  }
  func.func @transform_9(%arg0: i32) -> (i32, i32) {
    %c0_i32 = arith.constant 0 : i32
    %c0_i32_0 = arith.constant 0 : i32
    %c0_i32_1 = arith.constant 0 : i32
    return %c0_i32, %c0_i32_0 : i32, i32
  }
  func.func @transform_10(%arg0: i32) -> (i32, i32) {
    %c0_i32 = arith.constant 0 : i32
    %c0_i32_0 = arith.constant 0 : i32
    %c0_i32_1 = arith.constant 0 : i32
    return %c0_i32, %c0_i32_0 : i32, i32
  }
  func.func @transform_11(%arg0: i32) -> (i32, i32) {
    %c0_i32 = arith.constant 0 : i32
    %c0_i32_0 = arith.constant 0 : i32
    %c0_i32_1 = arith.constant 0 : i32
    return %c0_i32, %c0_i32_0 : i32, i32
  }
  func.func @transform_12(%arg0: i32) -> (i32, i32) {
    %c0_i32 = arith.constant 0 : i32
    %c0_i32_0 = arith.constant 0 : i32
    %c0_i32_1 = arith.constant 0 : i32
    return %c0_i32, %c0_i32_0 : i32, i32
  }
  func.func @transform_13(%arg0: i32) -> (i32, i32) {
    %c0_i32 = arith.constant 0 : i32
    %c0_i32_0 = arith.constant 0 : i32
    return %arg0, %c0_i32 : i32, i32
  }
}

</mosaic_0001>

<bundles_post_ra>
// kernel: tpu_custom_call.1
= control target key start
LH: loop header
LB: loop body
LE: loop exit
PB: predicated region body
PF: predicated region fallthrough
CT: control target
= control target key end

     0   :  { %s3397_s0 = inlined_call_operand.hbm [shape: bf16[32,128], index: 0, kind: input, shape index: {}]   ;;  %s3398_s1 = inlined_call_operand.hbm [shape: bf16[128,128], index: 1, kind: input, shape index: {}]   ;;  %s3399_s2 = inlined_call_operand.vmem [shape: f32[1,128], index: 2, kind: input, shape index: {}]   ;;  %s3400_s3 = inlined_call_operand.hbm [shape: bf16[128,128], index: 3, kind: input, shape index: {}]   ;;  %s3401_s4 = inlined_call_operand.vmem [shape: f32[1,128], index: 4, kind: input, shape index: {}]   ;;  %s3402_s5 = inlined_call_operand.hbm [shape: bf16[128,128], index: 5, kind: input, shape index: {}]   ;;  %s3403_s6 = inlined_call_operand.vmem [shape: f32[1,128], index: 6, kind: input, shape index: {}]   ;;  %s3404_s7 = inlined_call_operand.hbm [shape: bf16[128,128], index: 7, kind: input, shape index: {}]   ;;  %s3405_s8 = inlined_call_operand.vmem [shape: f32[1,128], index: 8, kind: input, shape index: {}]   ;;  %s3406_s9 = inlined_call_operand.hbm [shape: bf16[128,128], index: 9, kind: input, shape index: {}]   ;;  %s3407_s10 = inlined_call_operand.vmem [shape: f32[1,128], index: 10, kind: input, shape index: {}]   ;;  %s3408_s11 = inlined_call_operand.hbm [shape: bf16[128,128], index: 11, kind: input, shape index: {}]   ;;  %s3409_s12 = inlined_call_operand.vmem [shape: f32[1,128], index: 12, kind: input, shape index: {}]   ;;  %s3410_s13 = inlined_call_operand.hbm [shape: f32[32,128], index: 13, kind: output, shape index: {}]  }
   0x1   :  { %3417 = sst [smem:[#allocation21_spill]] %s3398_s1 }
   0x2   :  { %3418 = sst [smem:[#allocation22_spill]] %s3400_s3 }
   0x3   :  { %3419 = sst [smem:[#allocation23_spill]] %s3402_s5 }
   0x4   :  { %3420 = sst [smem:[#allocation24_spill]] %s3404_s7 }
   0x5   :  { %3421 = sst [smem:[#allocation25_spill]] %s3406_s9 }
   0x6   :  { %3422 = sst [smem:[#allocation26_spill]] %s3408_s11 }
   0x7   :  { %18 = vsyncpa [#allocation3], 0 }
   0x8   :  { %20 = vsyncpa [#allocation3 + $0x1], 0 }
   0x9   :  { %21 = vsyncpa [#allocation6], 0 }
   0xa   :  { %22 = vsyncpa [#allocation9], 0 }
   0xb   :  { %23 = vsyncpa [#allocation12], 0 }
   0xc   :  { %24 = vsyncpa [#allocation4], 0 }
   0xd   :  { %26 = vsyncpa [#allocation4 + $0x1], 0  ;;  %s2924_s25 = smov 0   ;;  %s2926_s26 = smov 0  }
   0xe   :  { %s2928_s27 = smov 0   ;;  %s2930_s28 = smov 0  }
   0xf LB: > { %s2837_s29 = smov [#allocation5]   ;;  %s2945_s14 = sadd.s32 4294967295, %s2835_s28   ;;  %s2835_s28 = sphi %s2930_s28, %s3455_s28   ;;  %s2831_s27 = sphi %s2928_s27, %s3454_s27   ;;  %s2827_s26 = sphi %s2926_s26, %s3453_s26   ;;  %s2823_s25 = sphi %s2924_s25, %s3452_s25  }
  0x10   : > { %s353_s30 = sshll.u32 %s2837_s29, 4  ;;  %p2031_p0 = scmp.ge.s32.totalorder %s2835_s28, 1  ;;  %s354_s30 = int_to_ptr.vmem [resolvable:$true] %s353_s30 }
  0x11   : > { %p3413_p1 = scmp.eq.s32.totalorder %s2945_s14, 0  ;;  %p341_p2 = scmp.lt.s32.totalorder %s2835_s28, 3 }
  0x12   : > { %s2838_s16 = smov [#allocation8]   ;;  %s2839_s19 = smov [#allocation11]  }
  0x13   : > { %p2950_p3 = pnand %p2031_p0, %p341_p2  ;;  %s385_s17 = sshll.u32 %s2838_s16, 4  ;;  %s2963_s17 = int_to_ptr.vmem [resolvable:$true] %s385_s17 }
  0x14   : > { %s417_s20 = sshll.u32 %s2839_s19, 4  ;;  %s2586_s22 = scalar_lea.vmem %s354_s30, 1024  ;;  %s2965_s20 = int_to_ptr.vmem [resolvable:$true] %s417_s20 }
  0x15   : > { %s3423_s15 = scalar_select %p2950_p3, 1, 0 }
  0x16   : > { %p2406_p5 = pneg %p2950_p3  ;;  %p2587_p8 = scmp.ne.s32.totalorder %s354_s30, %s2586_s22 }
  0x17   : > { %p2594_p11 = scmp.lt.s32.totalorder %s354_s30, %s354_s30  ;;  %p2595_p12 = scmp.lt.s32.totalorder %s2586_s22, %s2586_s22 }
  0x18   : > { %p2959_p6 = pnand %p2406_p5, %p3413_p1 }
  0x19   : > { %p2596_p13 = por %p2595_p12, %p2594_p11 }
  0x1a   : > { %p2969_p7 = pneg %p2959_p6 }
  0x1c   : > { %p2589_p9 = pnand %p2587_p8, %p2969_p7 }
  0x1e   : > { %p2590_p10 = pneg %p2589_p9 }
  0x20   : > { %p2597_p0 = pnand %p2596_p13, %p2590_p10 }
  0x22   : > { %2600 = shalt.err (!%p2597_p0)
}
  0x23   : > { %s3411_s23 = smov 64   ;;  %s3412_s24 = smov 4  }
  0x24   : > { %s3426_s1 = sld [smem:[#allocation21_spill]]  ;;  %s2612_s19 = scalar_lea.vmem %s2963_s17, 1024 }
  0x25   : > { %p2613_p2 = scmp.ne.s32.totalorder %s2963_s17, %s2612_s19  ;;  %p2620_p9 = scmp.lt.s32.totalorder %s2963_s17, %s2963_s17 }
  0x26   : > { %p2621_p10 = scmp.lt.s32.totalorder %s2612_s19, %s2612_s19 }
  0x27   : > { %p2615_p5 = pnand %p2613_p2, %p2969_p7 }
  0x28   : > { %p2622_p11 = por %p2621_p10, %p2620_p9 }
  0x29   : > { %p2616_p8 = pneg %p2615_p5 }
  0x2a   : > { %2409 = dma.hbm_to_vmem [thread:$0]  (!%p2959_p6), %s3426_s1, 1024, %s354_s30, [#allocation6], %s3411_s23, %s3411_s23, %s3412_s24  }
  0x2b   : > { %p2623_p12 = pnand %p2622_p11, %p2616_p8 }
  0x2d   : > { %2626 = shalt.err (!%p2623_p12)
}
  0x2e   : > { %s3427_s5 = sld [smem:[#allocation23_spill]]  ;;  %s2638_s30 = scalar_lea.vmem %s2965_s20, 1024 }
  0x2f   : > { %p2639_p13 = scmp.ne.s32.totalorder %s2965_s20, %s2638_s30  ;;  %p2646_p5 = scmp.lt.s32.totalorder %s2965_s20, %s2965_s20 }
  0x30   : > { %p2647_p8 = scmp.lt.s32.totalorder %s2638_s30, %s2638_s30 }
  0x31   : > { %p2641_p0 = pnand %p2639_p13, %p2969_p7 }
  0x32   : > { %p2648_p9 = por %p2647_p8, %p2646_p5 }
  0x33   : > { %p2642_p2 = pneg %p2641_p0 }
  0x34   : > { %2415 = dma.hbm_to_vmem [thread:$0]  (!%p2959_p6), %s3427_s5, 1024, %s2963_s17, [#allocation9], %s3411_s23, %s3411_s23, %s3412_s24  }
  0x35   : > { %p2649_p10 = pnand %p2648_p9, %p2642_p2 }
  0x37   : > { %2652 = shalt.err (!%p2649_p10)
}
  0x38   : > { %s3428_s9 = sld [smem:[#allocation25_spill]]  ;;  %s2842_s17 = smov [#allocation7]  }
  0x39   : > { %s369_s22 = sshll.u32 %s2842_s17, 4  ;;  %s2843_s29 = smov [#allocation10]   ;;  %s370_s22 = int_to_ptr.vmem [resolvable:$true] %s369_s22 }
  0x3a   : > { %s401_s1 = sshll.u32 %s2843_s29, 4  ;;  %s2664_s30 = scalar_lea.vmem %s370_s22, 1024  ;;  %s402_s1 = int_to_ptr.vmem [resolvable:$true] %s401_s1 }
  0x3b   : > { %p2665_p11 = scmp.ne.s32.totalorder %s370_s22, %s2664_s30  ;;  %p2672_p0 = scmp.lt.s32.totalorder %s370_s22, %s370_s22 }
  0x3c   : > { %p2673_p2 = scmp.lt.s32.totalorder %s2664_s30, %s2664_s30 }
  0x3d   : > { %p2667_p12 = pnand %p2665_p11, %p2969_p7 }
  0x3e   : > { %2421 = dma.hbm_to_vmem [thread:$0]  (!%p2959_p6), %s3428_s9, 1024, %s2965_s20, [#allocation12], %s3411_s23, %s3411_s23, %s3412_s24  }
  0x3f   : > { %p2668_p13 = pneg %p2667_p12  ;;  %p2674_p5 = por %p2673_p2, %p2672_p0 }
  0x41   : > { %p2675_p8 = pnand %p2674_p5, %p2668_p13 }
  0x43   : > { %2678 = shalt.err (!%p2675_p8)
}
  0x44   : > { %s3429_s3 = sld [smem:[#allocation22_spill]]  ;;  %s2690_s19 = scalar_lea.vmem %s402_s1, 1024 }
  0x45   : > { %p2691_p9 = scmp.ne.s32.totalorder %s402_s1, %s2690_s19  ;;  %p2698_p12 = scmp.lt.s32.totalorder %s402_s1, %s402_s1 }
  0x46   : > { %p2699_p0 = scmp.lt.s32.totalorder %s2690_s19, %s2690_s19 }
  0x47   : > { %p2693_p10 = pnand %p2691_p9, %p2969_p7 }
  0x48   : > { %p2700_p13 = por %p2699_p0, %p2698_p12 }
  0x49   : > { %p2694_p11 = pneg %p2693_p10 }
  0x4a   : > { %2412 = dma.hbm_to_vmem [thread:$0]  (!%p2959_p6), %s3429_s3, 1024, %s370_s22, [#allocation6], %s3411_s23, %s3411_s23, %s3412_s24  }
  0x4b   : > { %p2701_p2 = pnand %p2700_p13, %p2694_p11 }
  0x4d   : > { %2704 = shalt.err (!%p2701_p2)
}
  0x4e   : > { %s3430_s7 = sld [smem:[#allocation24_spill]]  ;;  %s2844_s22 = smov [#allocation13]  }
  0x4f   : > { %s433_s30 = sshll.u32 %s2844_s22, 4  ;;  %s434_s30 = int_to_ptr.vmem [resolvable:$true] %s433_s30 }
  0x50   : > { %s2716_s20 = scalar_lea.vmem %s434_s30, 1024  ;;  %p2724_p10 = scmp.lt.s32.totalorder %s434_s30, %s434_s30 }
  0x51   : > { %p2717_p5 = scmp.ne.s32.totalorder %s434_s30, %s2716_s20  ;;  %p2725_p11 = scmp.lt.s32.totalorder %s2716_s20, %s2716_s20 }
  0x53   : > { %p2719_p8 = pnand %p2717_p5, %p2969_p7  ;;  %p2726_p12 = por %p2725_p11, %p2724_p10 }
  0x54   : > { %2418 = dma.hbm_to_vmem [thread:$0]  (!%p2959_p6), %s3430_s7, 1024, %s402_s1, [#allocation9], %s3411_s23, %s3411_s23, %s3412_s24  }
  0x55   : > { %p2720_p9 = pneg %p2719_p8 }
  0x57   : > { %p2727_p0 = pnand %p2726_p12, %p2720_p9 }
  0x59   : > { %2730 = shalt.err (!%p2727_p0)
}
  0x5a   : > { %s3431_s11 = sld [smem:[#allocation26_spill]]  ;;  %s2030_s18 = sadd.s32 4294967294, %s2835_s28  }
  0x5b   : > { %s3045_s21 = sadd.s32 1, %s2835_s28   ;;  %s39_s17 = sadd.s32 1, %s2831_s27 }
  0x5c   : > { %s36_s19 = ssub.s32 %s2835_s28, %s3045_s21  ;;  %p46_p13 = scmp.ne.s32.totalorder %s2831_s27, %s2827_s26 }
  0x5d   : > { %p37_p7 = scmp.eq.s32.totalorder %s36_s19, 0  ;;  %p47_p2 = scmp.eq.s32.totalorder %s2835_s28, 0 }
  0x5e   : > { %p52_p5 = scmp.ne.s32.totalorder %s2827_s26, %s2823_s25  ;;  %p328_p9 = scmp.eq.s32.totalorder %s2945_s14, 1 }
  0x5f   : > { %s3056_s29 = scalar_select %p37_p7, %s2831_s27, %s39_s17  }
  0x60   : > { %2424 = dma.hbm_to_vmem [thread:$0]  (!%p2959_p6), %s3431_s11, 1024, %s434_s30, [#allocation12], %s3411_s23, %s3411_s23, %s3412_s24  }
  0x61   : > { %3432 = sst [smem:[#allocation20_spill]] %s3056_s29  ;;  %p3058_p8 = por %p47_p2, %p46_p13 }
  0x62   : > { %p3064_p6 = por %p3413_p1, %p52_p5  ;;  %p334_p10 = scmp.eq.s32.totalorder %s2030_s18, 1 }
  0x63   : > { %p2439_p11 = scmp.lt.s32.totalorder %s2835_s28, 2  ;;  %s450_s20 = sand.u32 1, %s2831_s27  }
  0x64   : > { %s3434_s30 = scalar_select %p3064_p6, 1, 0 }
  0x65   : > { %p3071_p12 = por %p328_p9, %p46_p13  ;;  %p3075_p0 = por %p334_p10, %p52_p5 }
  0x66   : > { %s2039_s19 = sshll.u32 %s450_s20, 3  ;;  %s2123_s17 = sshll.u32 %s2835_s28, 7 }
  0x67   : > { %s3435_s16 = scalar_select %p3071_p12, 1, 0 }
  0x68   : > { %s3436_s1 = scalar_select %p3075_p0, 1, 0 }
  0x69   : > { %s3083_s3 = scalar_lea.hbm %s3397_s0, %s2123_s17  ;;  %s454_s18 = scalar_lea.vmem [#allocation2], %s2039_s19 }
  0x6a   : > { %s461_s5 = sshll.u32 %s454_s18, 4  ;;  %p3089_p7 = pnand %p2439_p11, %p3058_p8  ;;  %s3085_s5 = int_to_ptr.vmem [resolvable:$true] %s461_s5 }
  0x6b   : > { %s3093_s9 = scalar_lea.sflag [#allocation3], %s450_s20  ;;  %s2731_s11 = scalar_lea.hbm %s3083_s3, 128 }
  0x6c   : > { %p2732_p13 = scmp.ne.s32.totalorder %s3083_s3, %s2731_s11  ;;  %p2733_p2 = pneg %p3089_p7 }
  0x6d   : > { %s2736_s19 = scalar_lea.hbm %s3397_s0, 256  ;;  %p2737_p8 = scmp.lt.s32.totalorder %s3083_s3, %s3397_s0 }
  0x6e   : > { %p2734_p5 = pnand %p2733_p2, %p2732_p13  ;;  %p2738_p10 = scmp.lt.s32.totalorder %s2736_s19, %s2731_s11 }
  0x70   : > { %p2735_p9 = pneg %p2734_p5  ;;  %p2739_p11 = por %p2738_p10, %p2737_p8 }
  0x72   : > { %p2740_p4 = pnand %p2739_p11, %p2735_p9 }
  0x74   : > { %2743 = shalt.err (!%p2740_p4)
}
  0x75   : > { %s2744_s22 = scalar_lea.vmem %s3085_s5, 128  ;;  %s2845_s20 = smov [#allocation2]  }
  0x76   : > { %p2745_p1 = scmp.ne.s32.totalorder %s3085_s5, %s2744_s22  ;;  %s2749_s29 = sshll.u32 %s2845_s20, 4  ;;  %s2750_s29 = int_to_ptr.vmem [resolvable:$false] %s2749_s29 }
  0x77   : > { %s2751_s23 = scalar_lea.vmem %s2750_s29, 256  ;;  %p2752_p5 = scmp.lt.s32.totalorder %s3085_s5, %s2750_s29 }
  0x78   : > { %p2747_p0 = pnand %p2745_p1, %p2733_p2  ;;  %p2753_p12 = scmp.lt.s32.totalorder %s2751_s23, %s2744_s22 }
  0x7a   : > { %p2748_p13 = pneg %p2747_p0  ;;  %p2754_p6 = por %p2753_p12, %p2752_p5 }
  0x7c   : > { %p2755_p3 = pnand %p2754_p6, %p2748_p13 }
  0x7e   : > { %2758 = shalt.err (!%p2755_p3)
}
  0x7f   : > { %s3438_s11 = smov 4   ;;  %s3439_s24 = smov 64  }
  0x80   : > { %2428 = dma.hbm_to_vmem [thread:$0]  (!%p3089_p7), %s3083_s3, 128, %s3085_s5, %s3093_s9, %s3439_s24, %s3439_s24, %s3438_s11  }
  0x81   : > { %p3440_p1 = scmp.ne.s32.totalorder %s3423_s15, 0 }
  0x82   : > { %s3120_s19 = sand.u32 (!%p3440_p1), 1, %s2827_s26   ;;  %p3441_p3 = scmp.ne.s32.totalorder (!%p3440_p1), %s3434_s30, 0 }
  0x83   : > { %473 = sbr.rel (%p3440_p1) target bundleno = 3487 (0xd9f), region = 72  ;;  %s2043_s29 = sshll.u32 (!%p3440_p1), %s3120_s19, 3 }
  0x84   : > { %s476_s17 = scalar_lea.sflag (!%p3440_p1), [#allocation3], %s3120_s19  ;;  %s3124_s18 = scalar_lea.vmem (!%p3440_p1), [#allocation2], %s2043_s29 }
  0x88   : > { %2802 = dma.done.wait (%p3441_p3), %s476_s17, 128  }
  0x89   : > { %2804 = vsyncadd (%p3441_p3), %s476_s17, 4294967168  ;;  %p3442_p4 = scmp.eq.s32.totalorder %s2945_s14, 0 }
  0x8b   : > { %2806 = dma.done.wait (%p3442_p4), [#allocation6], 2048   ;;  %p3443_p6 = pmov %p3442_p4 }
  0x8c   : > { %p3444_p12 = pmov %p3442_p4 }
  0x8d   : > { %2808 = vsyncadd (%p3443_p6), [#allocation6], 4294965248 }
  0x8e   : > { %2810 = dma.done.wait (%p3444_p12), [#allocation9], 2048   ;;  %p3445_p0 = pmov %p3442_p4 }
  0x90   : > { %2812 = vsyncadd (%p3445_p0), [#allocation9], 4294965248  ;;  %p3446_p7 = pmov %p3445_p0 }
  0x91   : > { %p3447_p2 = pmov %p3445_p0 }
  0x92   : > { %2814 = dma.done.wait (%p3446_p7), [#allocation12], 2048  }
  0x93   : > { %2816 = vsyncadd (%p3447_p2), [#allocation12], 4294965248  ;;  %v2846_v0 = vmov 0.0   ;;  %vm2847_vm0 = vmmov 0   ;;  %v2494_v1 = vld [vmem:[#allocation7 + $0x38] sm:$0xff]   ;;  %v2496_v3 = vld [vmem:[#allocation7 + $0x30] sm:$0xff]   ;;  %v896_v43 = vlaneseq }
  0x94   : > { %2218 = vmatprep.subr.bf16.mxu1 %v2846_v0  ;;  %2198 = vmatprep.subr.bf16.mxu0 %v2846_v0  ;;  %v2495_v2 = vld [vmem:[#allocation5 + $0x38] sm:$0xff]   ;;  %v2497_v4 = vld [vmem:[#allocation5 + $0x30] sm:$0xff]   ;;  %v2498_v5 = vld [vmem:[#allocation7 + $0x28] sm:$0xff]   ;;  %vm915_vm1 = vcmask 261120   ;;  %vm969_vm3 = vcmask 130048   ;;  %s2848_s15 = smov 96  }
  0x95   : > { %2234 = vmatprep.mubr.msk.bf16.mxu1 %vm2847_vm0, %v2846_v0  ;;  %2214 = vmatprep.mubr.msk.bf16.mxu0 %vm2847_vm0, %v2846_v0  ;;  %v2499_v6 = vld [vmem:[#allocation5 + $0x28] sm:$0xff]   ;;  %v2500_v7 = vld [vmem:[#allocation7 + $0x20] sm:$0xff]   ;;  %v2502_v9 = vld [vmem:[#allocation7 + $0x18] sm:$0xff]   ;;  %v3196_v44 = vand.u32 127, %v896_v43  ;;  %s2849_s20 = smov 64   ;;  %s2850_s23 = smov 32  }
  0x96   : > { %2219 = vmatpush3.bf16.msra.mxu1 %v2494_v1  ;;  %2199 = vmatpush3.bf16.msra.mxu0 %v2495_v2  ;;  %v2501_v8 = vld [vmem:[#allocation5 + $0x20] sm:$0xff]   ;;  %v2503_v10 = vld [vmem:[#allocation5 + $0x18] sm:$0xff]   ;;  %v2504_v11 = vld [vmem:[#allocation7 + $0x10] sm:$0xff]   ;;  %p3448_p8 = scmp.ne.s32.totalorder %s3435_s16, 0 }
  0x97   : > { %2220 = vmatprep.subr.bf16.mxu1 %v2846_v0  ;;  %2200 = vmatprep.subr.bf16.mxu0 %v2846_v0  ;;  %v2505_v12 = vld [vmem:[#allocation5 + $0x10] sm:$0xff]   ;;  %v2506_v13 = vld [vmem:[#allocation7 + $0x8] sm:$0xff]   ;;  %v2508_v15 = vld [vmem:[#allocation7] sm:$0xff]   ;;  %vm898_vm2 = vcmp.lt.s32.totalorder %v3196_v44, 8 }
  0x98   : > { %v2507_v14 = vld [vmem:[#allocation5 + $0x8] sm:$0xff]   ;;  %v2509_v16 = vld [vmem:[#allocation5] sm:$0xff]   ;;  %v2510_v17 = vld [vmem:[%s3124_s18] sm:$0xff]   ;;  %s2050_s18 = sshll.u32 %s3120_s19, 4 }
  0x99   : > { %v2061_v20 = vld [vmem:[%s3401_s4] ss:$0 sm:$0xff]  ;;  %v2511_v35 = vld [vmem:[#allocation8 + $0x38] sm:$0xff]   ;;  %v2513_v37 = vld [vmem:[#allocation8 + $0x28] sm:$0xff]   ;;  %s545_s7 = scalar_lea.vmem [#allocation14], %s2050_s18 }
  0x9a   : > { %2221 = vmatpush3.bf16.msra.mxu1 %v2496_v3  ;;  %2201 = vmatpush3.bf16.msra.mxu0 %v2497_v4  ;;  %v2051_v30 = vld [vmem:[%s3399_s2] ss:$0 sm:$0xff]  ;;  %v2514_v38 = vld [vmem:[#allocation8 + $0x20] sm:$0xff]   ;;  %v2515_v39 = vld [vmem:[#allocation8 + $0x18] sm:$0xff]   ;;  %s1900_s9 = sshll.u32 %s545_s7, 4  ;;  %s3349_s9 = int_to_ptr.vmem [resolvable:$true] %s1900_s9 }
  0x9b   : > { %2222 = vmatprep.subr.bf16.mxu1 %v2846_v0  ;;  %2202 = vmatprep.subr.bf16.mxu0 %v2846_v0  ;;  %v2512_v36 = vld [vmem:[#allocation8 + $0x30] sm:$0xff]   ;;  %v2517_v41 = vld [vmem:[#allocation8 + $0x8] sm:$0xff]   ;;  %v2518_v42 = vld [vmem:[#allocation8] sm:$0xff]   ;;  %s2759_s11 = scalar_lea.vmem %s3349_s9, 256 }
  0x9c   : > { %v2516_v40 = vld [vmem:[#allocation8 + $0x10] sm:$0xff]   ;;  %p2760_p9 = scmp.ne.s32.totalorder %s3349_s9, %s2759_s11 }
  0x9d   : > { %v2070_v2 = vld [vmem:[%s3403_s6] ss:$0 sm:$0xff] }
  0x9e   : > { %2223 = vmatpush3.bf16.msra.mxu1 %v2498_v5  ;;  %2203 = vmatpush3.bf16.msra.mxu0 %v2499_v6  ;;  %p2761_p10 = pnand %p2760_p9, %p3448_p8 }
  0x9f   : > { %2224 = vmatprep.subr.bf16.mxu1 %v2846_v0  ;;  %2204 = vmatprep.subr.bf16.mxu0 %v2846_v0 }
  0xa0   : > { %p2762_p11 = pneg %p2761_p10 }
  0xa2   : > { %2225 = vmatpush3.bf16.msra.mxu1 %v2500_v7  ;;  %2205 = vmatpush3.bf16.msra.mxu0 %v2501_v8 }
  0xa3   : > { %2226 = vmatprep.subr.bf16.mxu1 %v2846_v0  ;;  %2206 = vmatprep.subr.bf16.mxu0 %v2846_v0 }
  0xa6   : > { %2227 = vmatpush3.bf16.msra.mxu1 %v2502_v9  ;;  %2207 = vmatpush3.bf16.msra.mxu0 %v2503_v10 }
  0xa7   : > { %2228 = vmatprep.subr.bf16.mxu1 %v2846_v0  ;;  %2208 = vmatprep.subr.bf16.mxu0 %v2846_v0 }
  0xaa   : > { %2229 = vmatpush3.bf16.msra.mxu1 %v2504_v11  ;;  %2209 = vmatpush3.bf16.msra.mxu0 %v2505_v12 }
  0xab   : > { %2230 = vmatprep.subr.bf16.mxu1 %v2846_v0  ;;  %2210 = vmatprep.subr.bf16.mxu0 %v2846_v0 }
  0xae   : > { %2231 = vmatpush3.bf16.msra.mxu1 %v2506_v13  ;;  %2211 = vmatpush3.bf16.msra.mxu0 %v2507_v14 }
  0xaf   : > { %2232 = vmatprep.subr.bf16.mxu1 %v2846_v0  ;;  %2212 = vmatprep.subr.bf16.mxu0 %v2846_v0 }
  0xb2   : > { %2233 = vmatpush3.bf16.msra.mxu1 %v2508_v15  ;;  %2213 = vmatpush3.bf16.msra.mxu0 %v2509_v16 }
  0xb3   : > { %2258 = vmatprep.subr.bf16.mxu1 %v2846_v0  ;;  %2238 = vmatprep.subr.bf16.mxu0 %v2846_v0 }
  0xb5   : > { %2235 = vmatmul.mubr.bf16.vlgmr.msra.gmra.mxu1 %v2510_v17  ;;  %2215 = vmatmul.mubr.bf16.vlgmr.msra.gmra.mxu0 %v2510_v17 }
  0xb6   : > { %2260 = vmatprep.mubr.msk.bf16.mxu1 %vm2847_vm0, %v2846_v0  ;;  %2254 = vmatprep.mubr.msk.bf16.mxu0 %vm2847_vm0, %v2846_v0 }
  0xb7   : > { %2239 = vmatpush3.bf16.msra.mxu0 %v2511_v35 }
  0xb8   : > { %2240 = vmatprep.subr.bf16.mxu0 %v2846_v0 }
  0xbb   : > { %2241 = vmatpush3.bf16.msra.mxu0 %v2512_v36 }
  0xbc   : > { %2242 = vmatprep.subr.bf16.mxu0 %v2846_v0 }
  0xbf   : > { %2243 = vmatpush3.bf16.msra.mxu0 %v2513_v37 }
  0xc0   : > { %2244 = vmatprep.subr.bf16.mxu0 %v2846_v0 }
  0xc3   : > { %2245 = vmatpush3.bf16.msra.mxu0 %v2514_v38 }
  0xc4   : > { %2246 = vmatprep.subr.bf16.mxu0 %v2846_v0 }
  0xc7   : > { %2247 = vmatpush3.bf16.msra.mxu0 %v2515_v39 }
  0xc8   : > { %2248 = vmatprep.subr.bf16.mxu0 %v2846_v0 }
  0xcb   : > { %2249 = vmatpush3.bf16.msra.mxu0 %v2516_v40 }
  0xcc   : > { %2250 = vmatprep.subr.bf16.mxu0 %v2846_v0 }
  0xcf   : > { %2251 = vmatpush3.bf16.msra.mxu0 %v2517_v41 }
  0xd0   : > { %2252 = vmatprep.subr.bf16.mxu0 %v2846_v0 }
  0xd3   : > { %2253 = vmatpush3.bf16.msra.mxu0 %v2518_v42 }
  0xd4   : > { %2282 = vmatprep.subr.bf16.mxu0 %v2846_v0 }
  0xd6   : > { %2255 = vmatmul.mubr.bf16.vlgmr.msra.gmra.mxu0 %v2510_v17 }
  0xd7   : > { %2286 = vmatprep.mubr.msk.bf16.mxu0 %vm2847_vm0, %v2846_v0 }
 0x175   : > { %v774_v18 = vpop.f32.mrf.mxu1  ;;  %v662_v19 = vpop.f32.mrf.mxu0 }
 0x176   : > { %v775_v24 = vadd.f32 %v2061_v20, %v774_v18  ;;  %v663_v32 = vadd.f32 %v2051_v30, %v662_v19 }
 0x177   : > { %v2236_v21 = vpop.f32.mrf.mxu1  ;;  %v2216_v22 = vpop.f32.mrf.mxu0 }
 0x179   : > { %v777_v23 = vpop.f32.mrf.mxu1  ;;  %v665_v26 = vpop.f32.mrf.mxu0 }
 0x17a   : > { %v778_v25 = vadd.f32 %v2061_v20, %v777_v23  ;;  %v666_v33 = vadd.f32 %v2051_v30, %v665_v26 }
 0x17b   : > { %v2237_v27 = vpop.f32.mrf.mxu1  ;;  %v2217_v29 = vpop.f32.mrf.mxu0 }
 0x17c   : > { %v3172_v28 = vpack.c.bf16 %v778_v25, %v775_v24  ;;  %v3180_v34 = vpack.c.bf16 %v666_v33, %v663_v32 }
 0x17e   : > { %v920_v31 = vsel %vm915_vm1, %v3172_v28, 0 }
 0x17f   : > { %2259 = vmatpush3.bf16.xpose.msra.mxu1 %v920_v31 }
 0x180   : > { %2264 = vmatprep.subr.bf16.mxu1 %v2846_v0 }
 0x186   : > { %2261 = vmatmul.mubr.msk.bf16.vlgmr.msra.gmra.mxu1 %vm915_vm1, %v3180_v34 }
 0x187   : > { %2266 = vmatprep.mubr.msk.bf16.mxu1 %vm2847_vm0, %v2846_v0 }
 0x196   : > { %v886_v3 = vpop.f32.mrf.mxu0 }
 0x197   : > { %v887_v5 = vadd.f32 %v2070_v2, %v886_v3 }
 0x198   : > { %v2256_v4 = vpop.f32.mrf.mxu0 }
 0x19a   : > { %v889_v6 = vpop.f32.mrf.mxu0 }
 0x19b   : > { %v890_v7 = vadd.f32 %v2070_v2, %v889_v6 }
 0x19c   : > { %v2257_v8 = vpop.f32.mrf.mxu0 }
 0x19d   : > { %v3212_v9 = vpack.c.bf16 %v890_v7, %v887_v5 }
 0x19f   : > { %2265 = vmatpush3.bf16.msra.mxu1 %v3212_v9 }
 0x1a0   : > { %2270 = vmatprep.subr.bf16.mxu1 %v2846_v0 }
 0x246   : > { %v956_v45 = vpop.f32.mrf.mxu1 }
 0x247   : > { %v963_v46 = vmul.f32 0.35355338, %v956_v45 }
 0x248   : > { %v2262_v47 = vpop.f32.mrf.mxu1 }
 0x249   : > { %v967_v48 = vsel %vm898_vm2, %v963_v46, -1e+30 }
 0x24a   : > { %v959_v49 = vpop.f32.mrf.mxu1  ;;  %v970_v50 = vsel %vm969_vm3, %v967_v48, -inf }
 0x24b   : > { %v964_v51 = vmul.f32 0.35355338, %v959_v49  ;;  %971 = vmax.xlane.f32.xlu0 %v970_v50 }
 0x24c   : > { %v2263_v52 = vpop.f32.mrf.mxu1 }
 0x24d   : > { %v968_v53 = vsel %vm898_vm2, %v964_v51, -1e+30 }
 0x24e   : > { %v973_v54 = vsel %vm969_vm3, %v968_v53, -inf }
 0x24f   : > { %974 = vmax.xlane.f32.xlu0 %v973_v54 }
 0x265   : > { %1042 = vrot.lane.b32.xlu0 %v3172_v28, %s2848_s15 }
 0x2d4   : > { %v972_v55 = vpop.xlane.xlu0 %971 }
 0x2d5   : > { %v976_v56 = vsub.f32 %v967_v48, %v972_v55  ;;  %v2521_v48 = vld [vmem:[#allocation10 + $0x18] sm:$0xff]  }
 0x2d6   : > { %2283 = vmatpush3.bf16.msra.mxu0 %v2521_v48 }
 0x2d7   : > { %v978_v57 = vmul.f32 1.442695, %v976_v56  ;;  %2284 = vmatprep.subr.bf16.mxu0 %v2846_v0  ;;  %v2519_v56 = vld [vmem:[#allocation10 + $0x8] sm:$0xff]  }
 0x2d8   : > { %v975_v58 = vpop.xlane.xlu0 %974 }
 0x2d9   : > { %2543 = vpow2.f32 %v978_v57  ;;  %v977_v59 = vsub.f32 %v968_v53, %v975_v58  ;;  %v2520_v58 = vld [vmem:[#allocation10] sm:$0xff]  }
 0x2db   : > { %v980_v60 = vmul.f32 1.442695, %v977_v59  ;;  %v2522_v59 = vld [vmem:[#allocation10 + $0x10] sm:$0xff]  }
 0x2dc   : > { %v1043_v16 = vpop.permute.xlu0 %1042  ;;  %2285 = vmatpush3.bf16.msra.mxu0 %v2522_v59 }
 0x2dd   : > { %2545 = vpow2.f32 %v980_v60  ;;  %v1048_v18 = vsel %vm915_vm1, %v1043_v16, 0  ;;  %2298 = vmatprep.subr.bf16.mxu0 %v2846_v0 }
 0x2e6   : > { %v2544_v61 = vpop.eup %2543 }
 0x2e7   : > { %v982_v62 = vsel %vm969_vm3, %v2544_v61, 0.0 }
 0x2e8   : > { %983 = vadd.xlane.f32.xlu1 %v982_v62 }
 0x2ea   : > { %v2546_v63 = vpop.eup %2545 }
 0x2eb   : > { %v985_v1 = vsel %vm969_vm3, %v2546_v63, 0.0 }
 0x2ec   : > { %986 = vadd.xlane.f32.xlu1 %v985_v1 }
 0x2fd   : > { %1039 = vrot.lane.b32.xlu1 %v3180_v34, %s2848_s15 }
 0x371   : > { %v984_v10 = vpop.xlane.xlu1 %983 }
 0x372   : > { %2547 = vrcp.f32 %v984_v10 }
 0x375   : > { %v987_v11 = vpop.xlane.xlu1 %986 }
 0x376   : > { %2549 = vrcp.f32 %v987_v11 }
 0x379   : > { %v1040_v19 = vpop.permute.xlu1 %1039 }
 0x37f   : > { %v2548_v12 = vpop.eup %2547 }
 0x380   : > { %v990_v14 = vmul.f32 %v2548_v12, %v2544_v61 }
 0x383   : > { %v2550_v13 = vpop.eup %2549 }
 0x384   : > { %v991_v15 = vmul.f32 %v2550_v13, %v2546_v63 }
 0x386   : > { %v992_v17 = vpack.c.bf16 %v991_v15, %v990_v14 }
 0x388   : > { %2267 = vmatmul.mubr.msk.bf16.vlgmr.msra.gmra.mxu1 %vm969_vm3, %v992_v17 }
 0x389   : > { %2271 = vmatpush3.bf16.xpose.msra.mxu1 %v1048_v18  ;;  %2272 = vmatprep.mubr.msk.bf16.mxu1 %vm2847_vm0, %v2846_v0 }
 0x38a   : > { %2276 = vmatprep.subr.bf16.mxu1 %v2846_v0 }
 0x390   : > { %2273 = vmatmul.mubr.msk.bf16.vlgmr.msra.gmra.mxu1 %vm915_vm1, %v1040_v19 }
 0x391   : > { %2278 = vmatprep.mubr.msk.bf16.mxu1 %vm2847_vm0, %v2846_v0 }
 0x448   : > { %v1030_v20 = vpop.f32.mrf.mxu1 }
 0x44a   : > { %v2268_v21 = vpop.f32.mrf.mxu1 }
 0x44c   : > { %v1033_v22 = vpop.f32.mrf.mxu1 }
 0x44d   : > { %v1037_v23 = vpack.c.bf16 %v1033_v22, %v1030_v20 }
 0x44e   : > { %v2269_v24 = vpop.f32.mrf.mxu1 }
 0x450   : > { %v1084_v25 = vpop.f32.mrf.mxu1 }
 0x451   : > { %v1091_v26 = vmul.f32 0.35355338, %v1084_v25 }
 0x452   : > { %v2274_v27 = vpop.f32.mrf.mxu1 }
 0x453   : > { %v1093_v29 = vsel %vm898_vm2, %v1091_v26, -1e+30 }
 0x454   : > { %v1087_v30 = vpop.f32.mrf.mxu1  ;;  %v1095_v31 = vsel %vm969_vm3, %v1093_v29, -inf }
 0x455   : > { %v1092_v32 = vmul.f32 0.35355338, %v1087_v30  ;;  %1096 = vmax.xlane.f32.xlu1 %v1095_v31 }
 0x456   : > { %v2275_v33 = vpop.f32.mrf.mxu1 }
 0x457   : > { %v1094_v35 = vsel %vm898_vm2, %v1092_v32, -1e+30 }
 0x458   : > { %v1098_v36 = vsel %vm969_vm3, %v1094_v35, -inf }
 0x459   : > { %1099 = vmax.xlane.f32.xlu0 %v1098_v36 }
 0x4de   : > { %v1097_v37 = vpop.xlane.xlu1 %1096 }
 0x4df   : > { %v1101_v38 = vsub.f32 %v1093_v29, %v1097_v37 }
 0x4e1   : > { %v1103_v39 = vmul.f32 1.442695, %v1101_v38 }
 0x4e2   : > { %v1100_v40 = vpop.xlane.xlu0 %1099 }
 0x4e3   : > { %2551 = vpow2.f32 %v1103_v39  ;;  %v1102_v41 = vsub.f32 %v1094_v35, %v1100_v40 }
 0x4e5   : > { %v1105_v42 = vmul.f32 1.442695, %v1102_v41 }
 0x4e7   : > { %2553 = vpow2.f32 %v1105_v42 }
 0x4f0   : > { %v2552_v43 = vpop.eup %2551 }
 0x4f1   : > { %v1107_v45 = vsel %vm969_vm3, %v2552_v43, 0.0 }
 0x4f2   : > { %1108 = vadd.xlane.f32.xlu0 %v1107_v45 }
 0x4f4   : > { %v2554_v46 = vpop.eup %2553 }
 0x4f5   : > { %v1110_v47 = vsel %vm969_vm3, %v2554_v46, 0.0 }
 0x4f6   : > { %1111 = vadd.xlane.f32.xlu1 %v1110_v47  ;;  %v2524_v47 = vld [vmem:[#allocation10 + $0x20] sm:$0xff]  }
 0x507   : > { %1281 = vrot.lane.b32.xlu1 %v3172_v28, %s2849_s20 }
 0x508   : > { %1119 = vrot.lane.b32.xlu0 %v3212_v9, %s2848_s15  ;;  %s2124_s15 = sshll.u32 %s2945_s14, 8  ;;  %s2851_s14 = smov [#allocation14]  }
 0x509   : > { %s2763_s24 = sshll.u32 %s2851_s14, 4  ;;  %s2764_s24 = int_to_ptr.vmem [resolvable:$false] %s2763_s24 }
 0x50a   : > { %s2765_s29 = scalar_lea.vmem %s2764_s24, 512  ;;  %p2766_p13 = scmp.lt.s32.totalorder %s3349_s9, %s2764_s24 }
 0x50b   : > { %1279 = vrot.lane.b32.xlu1 %v3180_v34, %s2849_s20  ;;  %p2767_p5 = scmp.lt.s32.totalorder %s2765_s29, %s2759_s11 }
 0x50d   : > { %p2768_p1 = por %p2767_p5, %p2766_p13 }
 0x50f   : > { %p2769_p3 = pnand %p2768_p1, %p2762_p11 }
 0x57b   : > { %v1109_v49 = vpop.xlane.xlu0 %1108 }
 0x57c   : > { %2555 = vrcp.f32 %v1109_v49 }
 0x57f   : > { %v1112_v50 = vpop.xlane.xlu1 %1111  ;;  %v1120_v51 = vpop.permute.xlu0 %1119 }
 0x580   : > { %2557 = vrcp.f32 %v1112_v50  ;;  %2277 = vmatpush3.bf16.msra.mxu1 %v1120_v51 }
 0x581   : > { %2290 = vmatprep.subr.bf16.mxu1 %v2846_v0 }
 0x583   : > { %v1282_v62 = vpop.permute.xlu1 %1281 }
 0x584   : > { %v1287_v3 = vsel %vm915_vm1, %v1282_v62, 0 }
 0x587   : > { %v1280_v7 = vpop.permute.xlu1 %1279 }
 0x589   : > { %v2556_v52 = vpop.eup %2555 }
 0x58a   : > { %v1115_v54 = vmul.f32 %v2556_v52, %v2552_v43 }
 0x58d   : > { %v2558_v53 = vpop.eup %2557 }
 0x58e   : > { %v1116_v55 = vmul.f32 %v2558_v53, %v2554_v46  ;;  %v2523_v46 = vld [vmem:[#allocation10 + $0x28] sm:$0xff]  }
 0x590   : > { %v1117_v57 = vpack.c.bf16 %v1116_v55, %v1115_v54 }
 0x592   : > { %2279 = vmatmul.mubr.msk.bf16.vlgmr.msra.gmra.mxu1 %vm969_vm3, %v1117_v57 }
 0x593   : > { %2291 = vmatpush3.bf16.msra.mxu1 %v2519_v56  ;;  %2294 = vmatprep.mubr.msk.bf16.mxu1 %vm2847_vm0, %v2846_v0 }
 0x594   : > { %2292 = vmatprep.subr.bf16.mxu1 %v2846_v0 }
 0x597   : > { %2293 = vmatpush3.bf16.msra.mxu1 %v2520_v58 }
 0x598   : > { %2304 = vmatprep.subr.bf16.mxu1 %v2846_v0 }
 0x59a   : > { %2295 = vmatmul.mubr.msk.bf16.vlgmr.msra.gmra.mxu1 %vm915_vm1, %v1037_v23 }
 0x59b   : > { %2306 = vmatprep.mubr.msk.bf16.mxu1 %vm2847_vm0, %v2846_v0 }
 0x652   : > { %v1159_v60 = vpop.f32.mrf.mxu1 }
 0x654   : > { %v2280_v61 = vpop.f32.mrf.mxu1 }
 0x656   : > { %v1162_v63 = vpop.f32.mrf.mxu1 }
 0x657   : > { %v1166_v1 = vpack.c.bf16 %v1162_v63, %v1159_v60 }
 0x658   : > { %v2281_v2 = vpop.f32.mrf.mxu1 }
 0x659   : > { %2287 = vmatmul.mubr.msk.bf16.vlgmr.msra.gmra.mxu0 %vm915_vm1, %v1166_v1 }
 0x65a   : > { %2299 = vmatpush3.bf16.xpose.msra.mxu0 %v1287_v3  ;;  %v3253_v4 = vpop.f32.mrf.mxu1  ;;  %2300 = vmatprep.mubr.msk.bf16.mxu0 %vm2847_vm0, %v2846_v0 }
 0x65b   : > { %2310 = vmatprep.subr.bf16.mxu0 %v2846_v0 }
 0x65c   : > { %v2296_v5 = vpop.f32.mrf.mxu1 }
 0x65e   : > { %v3258_v6 = vpop.f32.mrf.mxu1 }
 0x660   : > { %v2297_v8 = vpop.f32.mrf.mxu1 }
 0x661   : > { %2301 = vmatmul.mubr.msk.bf16.vlgmr.msra.gmra.mxu0 %vm915_vm1, %v1280_v7 }
 0x662   : > { %2314 = vmatprep.mubr.msk.bf16.mxu0 %vm2847_vm0, %v2846_v0  ;;  %2311 = vmatpush3.bf16.msra.mxu0 %v2523_v46 }
 0x663   : > { %2312 = vmatprep.subr.bf16.mxu0 %v2846_v0 }
 0x666   : > { %2313 = vmatpush3.bf16.msra.mxu0 %v2524_v47 }
 0x667   : > { %2324 = vmatprep.subr.bf16.mxu0 %v2846_v0 }
 0x719   : > { %v3263_v10 = vpop.f32.mrf.mxu0 }
 0x71a   : > { %v1273_v44 = vadd.f32 %v3253_v4, %v3263_v10 }
 0x71b   : > { %v2288_v11 = vpop.f32.mrf.mxu0 }
 0x71d   : > { %v3265_v12 = vpop.f32.mrf.mxu0 }
 0x71f   : > { %v2289_v13 = vpop.f32.mrf.mxu0 }
 0x721   : > { %v1323_v14 = vpop.f32.mrf.mxu0 }
 0x722   : > { %v1330_v15 = vmul.f32 0.35355338, %v1323_v14 }
 0x723   : > { %v2302_v16 = vpop.f32.mrf.mxu0 }
 0x724   : > { %v1332_v17 = vsel %vm898_vm2, %v1330_v15, -1e+30 }
 0x725   : > { %v1326_v18 = vpop.f32.mrf.mxu0  ;;  %v1334_v19 = vsel %vm969_vm3, %v1332_v17, -inf }
 0x726   : > { %v1331_v20 = vmul.f32 0.35355338, %v1326_v18  ;;  %1335 = vmax.xlane.f32.xlu1 %v1334_v19  ;;  %v1276_v18 = vadd.f32 %v3258_v6, %v3265_v12  ;;  %v2525_v6 = vld [vmem:[#allocation10 + $0x38] sm:$0xff]   ;;  %v2526_v12 = vld [vmem:[#allocation10 + $0x30] sm:$0xff]  }
 0x727   : > { %v2303_v21 = vpop.f32.mrf.mxu0 }
 0x728   : > { %v1333_v22 = vsel %vm898_vm2, %v1331_v20, -1e+30 }
 0x729   : > { %v1337_v23 = vsel %vm969_vm3, %v1333_v22, -inf }
 0x72a   : > { %1338 = vmax.xlane.f32.xlu0 %v1337_v23 }
 0x737   : > { %1357 = vrot.lane.b32.xlu1 %v3212_v9, %s2849_s20  ;;  %s3354_s20 = scalar_lea.hbm %s3410_s13, %s2124_s15 }
 0x73b   : > { %1463 = vrot.lane.b32.xlu1 %v3180_v34, %s2850_s23 }
 0x7af   : > { %v1336_v24 = vpop.xlane.xlu1 %1335 }
 0x7b0   : > { %v1340_v25 = vsub.f32 %v1332_v17, %v1336_v24 }
 0x7b2   : > { %v1342_v26 = vmul.f32 1.442695, %v1340_v25 }
 0x7b3   : > { %v1358_v27 = vpop.permute.xlu1 %1357  ;;  %v1339_v29 = vpop.xlane.xlu0 %1338 }
 0x7b4   : > { %2559 = vpow2.f32 %v1342_v26  ;;  %v1341_v30 = vsub.f32 %v1333_v22, %v1339_v29  ;;  %2305 = vmatpush3.bf16.msra.mxu1 %v1358_v27  ;;  %v2527_v27 = vld [vmem:[#allocation11 + $0x38] sm:$0xff]   ;;  %v2528_v29 = vld [vmem:[#allocation11 + $0x30] sm:$0xff]  }
 0x7b5   : > { %2318 = vmatprep.subr.bf16.mxu1 %v2846_v0 }
 0x7b6   : > { %v1344_v31 = vmul.f32 1.442695, %v1341_v30  ;;  %v2529_v30 = vld [vmem:[#allocation11 + $0x28] sm:$0xff]  }
 0x7b8   : > { %2561 = vpow2.f32 %v1344_v31  ;;  %v2530_v31 = vld [vmem:[#allocation11 + $0x20] sm:$0xff]  }
 0x7c1   : > { %v2560_v32 = vpop.eup %2559 }
 0x7c2   : > { %v1346_v33 = vsel %vm969_vm3, %v2560_v32, 0.0 }
 0x7c3   : > { %1347 = vadd.xlane.f32.xlu0 %v1346_v33 }
 0x7c5   : > { %v2562_v35 = vpop.eup %2561 }
 0x7c6   : > { %v1349_v36 = vsel %vm969_vm3, %v2562_v35, 0.0 }
 0x7c7   : > { %1350 = vadd.xlane.f32.xlu0 %v1349_v36 }
 0x7dd   : > { %1465 = vrot.lane.b32.xlu0 %v3172_v28, %s2850_s23  ;;  %v1464_v28 = vpop.permute.xlu1 %1463 }
 0x84c   : > { %v1348_v34 = vpop.xlane.xlu0 %1347 }
 0x84d   : > { %2563 = vrcp.f32 %v1348_v34 }
 0x850   : > { %v1351_v37 = vpop.xlane.xlu0 %1350 }
 0x851   : > { %2565 = vrcp.f32 %v1351_v37 }
 0x854   : > { %v1466_v42 = vpop.permute.xlu0 %1465 }
 0x855   : > { %v1471_v45 = vsel %vm915_vm1, %v1466_v42, 0  ;;  %v2536_v42 = vld [vmem:[#allocation13 + $0x30] sm:$0xff]  }
 0x85a   : > { %v2564_v38 = vpop.eup %2563 }
 0x85b   : > { %v1354_v40 = vmul.f32 %v2564_v38, %v2560_v32  ;;  %v2531_v32 = vld [vmem:[#allocation11 + $0x18] sm:$0xff]   ;;  %v2532_v38 = vld [vmem:[#allocation11 + $0x10] sm:$0xff]  }
 0x85e   : > { %v2566_v39 = vpop.eup %2565 }
 0x85f   : > { %v1355_v41 = vmul.f32 %v2566_v39, %v2562_v35  ;;  %v2533_v39 = vld [vmem:[#allocation11 + $0x8] sm:$0xff]  }
 0x861   : > { %v1356_v43 = vpack.c.bf16 %v1355_v41, %v1354_v40  ;;  %v2534_v40 = vld [vmem:[#allocation11] sm:$0xff]   ;;  %v2535_v41 = vld [vmem:[#allocation13 + $0x38] sm:$0xff]  }
 0x863   : > { %2307 = vmatmul.mubr.msk.bf16.vlgmr.msra.gmra.mxu1 %vm969_vm3, %v1356_v43  ;;  %v2537_v43 = vld [vmem:[#allocation13 + $0x28] sm:$0xff]  }
 0x864   : > { %2319 = vmatpush3.bf16.xpose.msra.mxu1 %v1471_v45  ;;  %2320 = vmatprep.mubr.msk.bf16.mxu1 %vm2847_vm0, %v2846_v0  ;;  %v2538_v45 = vld [vmem:[#allocation13 + $0x20] sm:$0xff]  }
 0x865   : > { %2330 = vmatprep.subr.bf16.mxu1 %v2846_v0 }
 0x86b   : > { %2321 = vmatmul.mubr.msk.bf16.vlgmr.msra.gmra.mxu1 %vm915_vm1, %v1464_v28  ;;  %v2539_v28 = vld [vmem:[#allocation13 + $0x18] sm:$0xff]  }
 0x86c   : > { %2334 = vmatprep.mubr.msk.bf16.mxu1 %vm2847_vm0, %v2846_v0  ;;  %2331 = vmatpush3.bf16.msra.mxu1 %v2525_v6 }
 0x86d   : > { %2332 = vmatprep.subr.bf16.mxu1 %v2846_v0 }
 0x870   : > { %2333 = vmatpush3.bf16.msra.mxu1 %v2526_v12 }
 0x871   : > { %2358 = vmatprep.subr.bf16.mxu1 %v2846_v0 }
 0x923   : > { %v1397_v48 = vpop.f32.mrf.mxu1 }
 0x925   : > { %v2308_v49 = vpop.f32.mrf.mxu1 }
 0x926   : > { %v2099_v49 = vld [vmem:[%s3405_s8] ss:$0 sm:$0xff] }
 0x927   : > { %v1400_v50 = vpop.f32.mrf.mxu1 }
 0x928   : > { %v1404_v51 = vpack.c.bf16 %v1400_v50, %v1397_v48 }
 0x929   : > { %v2309_v52 = vpop.f32.mrf.mxu1 }
 0x92a   : > { %2315 = vmatmul.mubr.msk.bf16.vlgmr.msra.gmra.mxu0 %vm915_vm1, %v1404_v51 }
 0x92b   : > { %v1507_v53 = vpop.f32.mrf.mxu1  ;;  %2326 = vmatprep.mubr.msk.bf16.mxu0 %vm2847_vm0, %v2846_v0 }
 0x92c   : > { %v1514_v54 = vmul.f32 0.35355338, %v1507_v53 }
 0x92d   : > { %v2322_v55 = vpop.f32.mrf.mxu1 }
 0x92e   : > { %v1516_v56 = vsel %vm898_vm2, %v1514_v54, -1e+30 }
 0x92f   : > { %v1510_v57 = vpop.f32.mrf.mxu1  ;;  %v1518_v58 = vsel %vm969_vm3, %v1516_v56, -inf }
 0x930   : > { %v1515_v59 = vmul.f32 0.35355338, %v1510_v57  ;;  %1519 = vmax.xlane.f32.xlu1 %v1518_v58  ;;  %v2541_v57 = vld [vmem:[#allocation13 + $0x8] sm:$0xff]   ;;  %v2542_v58 = vld [vmem:[#allocation13] sm:$0xff]  }
 0x931   : > { %v2323_v60 = vpop.f32.mrf.mxu1 }
 0x932   : > { %v1517_v61 = vsel %vm898_vm2, %v1515_v59, -1e+30  ;;  %v2100_v59 = vld [vmem:[%s3407_s10] ss:$0 sm:$0xff] }
 0x933   : > { %v1521_v62 = vsel %vm969_vm3, %v1517_v61, -inf }
 0x934   : > { %1522 = vmax.xlane.f32.xlu0 %v1521_v62 }
 0x9b9   : > { %v1520_v63 = vpop.xlane.xlu1 %1519 }
 0x9ba   : > { %v1524_v1 = vsub.f32 %v1516_v56, %v1520_v63  ;;  %v2540_v56 = vld [vmem:[#allocation13 + $0x10] sm:$0xff]  }
 0x9bc   : > { %v1526_v2 = vmul.f32 1.442695, %v1524_v1 }
 0x9bd   : > { %v1523_v3 = vpop.xlane.xlu0 %1522 }
 0x9be   : > { %2567 = vpow2.f32 %v1526_v2  ;;  %v1525_v5 = vsub.f32 %v1517_v61, %v1523_v3 }
 0x9c0   : > { %v1528_v7 = vmul.f32 1.442695, %v1525_v5 }
 0x9c2   : > { %2569 = vpow2.f32 %v1528_v7 }
 0x9cb   : > { %v2568_v8 = vpop.eup %2567 }
 0x9cc   : > { %v1530_v11 = vsel %vm969_vm3, %v2568_v8, 0.0 }
 0x9cd   : > { %1531 = vadd.xlane.f32.xlu0 %v1530_v11 }
 0x9cf   : > { %v2570_v13 = vpop.eup %2569 }
 0x9d0   : > { %v1533_v14 = vsel %vm969_vm3, %v2570_v13, 0.0 }
 0x9d1   : > { %1534 = vadd.xlane.f32.xlu1 %v1533_v14 }
 0x9e3   : > { %1541 = vrot.lane.b32.xlu0 %v3212_v9, %s2850_s23  ;;  %s1887_s23 = scalar_lea.sflag [#allocation4], %s3120_s19 }
 0x9ea   : > { %v1454_v15 = vpop.f32.mrf.mxu0 }
 0x9eb   : > { %v3307_v16 = vadd.f32 %v1454_v15, %v1273_v44 }
 0x9ec   : > { %v2316_v17 = vpop.f32.mrf.mxu0 }
 0x9ee   : > { %v1457_v19 = vpop.f32.mrf.mxu0 }
 0x9ef   : > { %v3311_v20 = vadd.f32 %v1457_v19, %v1276_v18 }
 0x9f0   : > { %v2317_v21 = vpop.f32.mrf.mxu0 }
 0xa56   : > { %v1532_v22 = vpop.xlane.xlu0 %1531 }
 0xa57   : > { %2571 = vrcp.f32 %v1532_v22 }
 0xa5a   : > { %v1535_v23 = vpop.xlane.xlu1 %1534  ;;  %v1542_v24 = vpop.permute.xlu0 %1541 }
 0xa5b   : > { %2573 = vrcp.f32 %v1535_v23  ;;  %2325 = vmatpush3.bf16.msra.mxu0 %v1542_v24 }
 0xa5c   : > { %2338 = vmatprep.subr.bf16.mxu0 %v2846_v0 }
 0xa64   : > { %v2572_v9 = vpop.eup %2571 }
 0xa65   : > { %v1538_v25 = vmul.f32 %v2572_v9, %v2568_v8 }
 0xa68   : > { %v2574_v4 = vpop.eup %2573 }
 0xa69   : > { %v1539_v10 = vmul.f32 %v2574_v4, %v2570_v13 }
 0xa6b   : > { %v1540_v26 = vpack.c.bf16 %v1539_v10, %v1538_v25 }
 0xa6d   : > { %2327 = vmatmul.mubr.msk.bf16.vlgmr.msra.gmra.mxu0 %vm969_vm3, %v1540_v26 }
 0xa6e   : > { %2354 = vmatprep.mubr.msk.bf16.mxu0 %vm2847_vm0, %v2846_v0  ;;  %2339 = vmatpush3.bf16.msra.mxu0 %v2527_v27 }
 0xa6f   : > { %2340 = vmatprep.subr.bf16.mxu0 %v2846_v0 }
 0xa72   : > { %2341 = vmatpush3.bf16.msra.mxu0 %v2528_v29 }
 0xa73   : > { %2342 = vmatprep.subr.bf16.mxu0 %v2846_v0 }
 0xa76   : > { %2343 = vmatpush3.bf16.msra.mxu0 %v2529_v30 }
 0xa77   : > { %2344 = vmatprep.subr.bf16.mxu0 %v2846_v0 }
 0xa7a   : > { %2345 = vmatpush3.bf16.msra.mxu0 %v2530_v31 }
 0xa7b   : > { %2346 = vmatprep.subr.bf16.mxu0 %v2846_v0 }
 0xa7e   : > { %2347 = vmatpush3.bf16.msra.mxu0 %v2531_v32 }
 0xa7f   : > { %2348 = vmatprep.subr.bf16.mxu0 %v2846_v0 }
 0xa82   : > { %2349 = vmatpush3.bf16.msra.mxu0 %v2532_v38 }
 0xa83   : > { %2350 = vmatprep.subr.bf16.mxu0 %v2846_v0 }
 0xa86   : > { %2351 = vmatpush3.bf16.msra.mxu0 %v2533_v39 }
 0xa87   : > { %2352 = vmatprep.subr.bf16.mxu0 %v2846_v0 }
 0xa8a   : > { %2353 = vmatpush3.bf16.msra.mxu0 %v2534_v40 }
 0xb2d   : > { %v1581_v33 = vpop.f32.mrf.mxu0 }
 0xb2f   : > { %v2328_v35 = vpop.f32.mrf.mxu0 }
 0xb31   : > { %v1584_v36 = vpop.f32.mrf.mxu0 }
 0xb32   : > { %v1588_v34 = vpack.c.bf16 %v1584_v36, %v1581_v33 }
 0xb33   : > { %v2329_v37 = vpop.f32.mrf.mxu0 }
 0xb34   : > { %2335 = vmatmul.mubr.msk.bf16.vlgmr.msra.gmra.mxu1 %vm915_vm1, %v1588_v34 }
 0xb35   : > { %2374 = vmatprep.mubr.msk.bf16.mxu1 %vm2847_vm0, %v2846_v0  ;;  %2359 = vmatpush3.bf16.msra.mxu1 %v2535_v41 }
 0xb36   : > { %2360 = vmatprep.subr.bf16.mxu1 %v2846_v0 }
 0xb39   : > { %2361 = vmatpush3.bf16.msra.mxu1 %v2536_v42 }
 0xb3a   : > { %2362 = vmatprep.subr.bf16.mxu1 %v2846_v0 }
 0xb3d   : > { %2363 = vmatpush3.bf16.msra.mxu1 %v2537_v43 }
 0xb3e   : > { %2364 = vmatprep.subr.bf16.mxu1 %v2846_v0 }
 0xb41   : > { %2365 = vmatpush3.bf16.msra.mxu1 %v2538_v45 }
 0xb42   : > { %2366 = vmatprep.subr.bf16.mxu1 %v2846_v0 }
 0xb45   : > { %2367 = vmatpush3.bf16.msra.mxu1 %v2539_v28 }
 0xb46   : > { %2368 = vmatprep.subr.bf16.mxu1 %v2846_v0 }
 0xb49   : > { %2369 = vmatpush3.bf16.msra.mxu1 %v2540_v56 }
 0xb4a   : > { %2370 = vmatprep.subr.bf16.mxu1 %v2846_v0 }
 0xb4d   : > { %2371 = vmatpush3.bf16.msra.mxu1 %v2541_v57 }
 0xb4e   : > { %2372 = vmatprep.subr.bf16.mxu1 %v2846_v0  ;;  %v2109_v0 = vld [vmem:[%s3409_s12] ss:$0 sm:$0xff] }
 0xb51   : > { %2373 = vmatpush3.bf16.msra.mxu1 %v2542_v58 }
 0xbf4   : > { %v1638_v46 = vpop.f32.mrf.mxu1 }
 0xbf5   : > { %v1645_v48 = vadd.f32 %v1638_v46, %v3307_v16 }
 0xbf6   : > { %v2336_v47 = vpop.f32.mrf.mxu1 }
 0xbf7   : > { %v1654_v53 = vadd.f32 %v2099_v49, %v1645_v48 }
 0xbf8   : > { %v1641_v50 = vpop.f32.mrf.mxu1 }
 0xbf9   : > { %v1646_v51 = vadd.f32 %v1641_v50, %v3311_v20 }
 0xbfa   : > { %v2337_v52 = vpop.f32.mrf.mxu1 }
 0xbfb   : > { %v1655_v54 = vadd.f32 %v2099_v49, %v1646_v51 }
 0xbfd   : > { %v1656_v55 = vpack.c.bf16 %v1655_v54, %v1654_v53 }
 0xbff   : > { %2355 = vmatmul.mubr.bf16.vlgmr.msra.gmra.mxu0 %v1656_v55 }
 0xcbf   : > { %v1762_v60 = vpop.f32.mrf.mxu0 }
 0xcc0   : > { %v1763_v62 = vadd.f32 %v2100_v59, %v1762_v60 }
 0xcc1   : > { %v2356_v61 = vpop.f32.mrf.mxu0 }
 0xcc2   : > { %v1769_v3 = vmax.f32 %v1763_v62, 0.0 }
 0xcc3   : > { %v1765_v63 = vpop.f32.mrf.mxu0 }
 0xcc4   : > { %v1766_v1 = vadd.f32 %v2100_v59, %v1765_v63 }
 0xcc5   : > { %v2357_v2 = vpop.f32.mrf.mxu0 }
 0xcc6   : > { %v1770_v5 = vmax.f32 %v1766_v1, 0.0 }
 0xcc8   : > { %v1771_v7 = vpack.c.bf16 %v1770_v5, %v1769_v3 }
 0xcca   : > { %2375 = vmatmul.mubr.bf16.vlgmr.msra.gmra.mxu1 %v1771_v7 }
 0xd8a   : > { %v1877_v8 = vpop.f32.mrf.mxu1 }
 0xd8b   : > { %v1878_v11 = vadd.f32 %v2109_v0, %v1877_v8 }
 0xd8c   : > { %v2376_v13 = vpop.f32.mrf.mxu1 }
 0xd8d   : > { %1884 = vst [vmem:[%s545_s7] sm:$0xff] %v1878_v11 }
 0xd8e   : > { %v1880_v14 = vpop.f32.mrf.mxu1 }
 0xd8f   : > { %v1881_v44 = vadd.f32 %v2109_v0, %v1880_v14 }
 0xd90   : > { %v2377_v15 = vpop.f32.mrf.mxu1 }
 0xd91   : > { %1885 = vst [vmem:[%s545_s7 + $0x8] sm:$0xff] %v1881_v44 }
 0xd92   : > { %2772 = shalt.err (!%p2769_p3)
}
 0xd93   : > { %s2773_s17 = scalar_lea.hbm %s3354_s20, 256  ;;  %s2777_s5 = scalar_lea.hbm %s3410_s13, 512 }
 0xd94   : > { %p2774_p4 = scmp.ne.s32.totalorder %s3354_s20, %s2773_s17  ;;  %p2778_p0 = scmp.lt.s32.totalorder %s3354_s20, %s3410_s13 }
 0xd95   : > { %p2779_p7 = scmp.lt.s32.totalorder %s2777_s5, %s2773_s17 }
 0xd96   : > { %p2775_p6 = pnand %p2774_p4, %p3448_p8 }
 0xd97   : > { %p2780_p2 = por %p2779_p7, %p2778_p0 }
 0xd98   : > { %p2776_p12 = pneg %p2775_p6 }
 0xd9a   : > { %p2781_p9 = pnand %p2780_p2, %p2776_p12 }
 0xd9c   : > { %2784 = shalt.err (!%p2781_p9)
}
 0xd9d   : > { %s2852_s30 = smov 128   ;;  %s2853_s22 = smov 8  }
 0xd9e   : > { %2404 = dma.vmem_to_hbm [thread:$0]  (%p3448_p8), %s3349_s9, 256, %s3354_s20, %s1887_s23, %s2852_s30, %s2852_s30, %s2853_s22  }
 0xd9f PF: > { %s1915_s11 = sand.u32 1, %s2823_s25   ;;  %p3449_p10 = scmp.ne.s32.totalorder %s3436_s1, 0 }
 0xda0   : > { %p3450_p11 = scmp.ge.s32.totalorder %s2835_s28, 2  ;;  %s1916_s14 = scalar_lea.sflag [#allocation4], %s1915_s11 }
 0xda2   : > { %p2430_p13 = pnand %p3450_p11, %p3449_p10 }
 0xda4   : > { %p2431_p5 = pneg %p2430_p13 }
 0xda6   : > { %2818 = dma.done.wait (%p2431_p5), %s1916_s14, 256  }
 0xda7   : > { %2820 = vsyncadd (%p2431_p5), %s1916_s14, 4294967040  ;;  %s3451_s24 = sld [smem:[#allocation20_spill]]  ;;  %p29_p1 = scmp.ge.s32.totalorder %s3045_s21, 4  }
 0xda8   : > { %s3452_s25 = smov %s2827_s26  ;;  %s3453_s26 = smov %s2831_s27 }
 0xda9   : > { %s3455_s28 = smov %s3045_s21  ;;  %31 = sbr.rel (!%p29_p1) target bundleno = 15 (0xf), region = 141 }
 0xdad   : > { %s3454_s27 = smov %s3451_s24 }
 0xdae   :  { %1921 = vsyncpa [#allocation3], 1 }
 0xdaf   :  { %1923 = vsyncpa [#allocation3 + $0x1], 1 }
 0xdb0   :  { %1924 = vsyncpa [#allocation6], 1 }
 0xdb1   :  { %1925 = vsyncpa [#allocation9], 1 }
 0xdb2   :  { %1926 = vsyncpa [#allocation12], 1 }
 0xdb3   :  { %1927 = vsyncpa [#allocation4], 1 }
 0xdb4   :  { %1929 = vsyncpa [#allocation4 + $0x1], 1 }

</bundles_post_ra>
